<compile_context>
chip_gen: v7x
topology: tpu7x:2x2x1
jax: 0.10.0
libtpu: 0.0.40
codegen_flags: <defaults>
</compile_context>

<pallas_src>
import math
import functools

import jax
import jax.numpy as jnp
from jax import lax
from jax.experimental import pallas as pl
from jax.experimental.pallas import tpu as pltpu


def _cdiv(a, b):
    return -(-a // b)


# ------------------------------ fused kernel ---------------------------------

def _fused_mhattn_kernel(*refs, ks, t_q, t_k, rn, nb_head, d_k,
                         compute_dtype, has_mask):
    """One (batch, node-block) tile of Rn nodes per grid step.

    qp_ref: (1, Rn, T+ks-1, D)   left-padded query (causal conv input)
    kp_ref: (1, Rn, T+2*pk,  D)  both-sides padded key ('same' conv input)
    v_ref : (1, Rn, T, D)        value
    m_ref : (1, T, T2)           additive mask bias (0 / -1e9), only if has_mask
    wq/wk : (ks*D, D) im2col conv weights,  bq/bk/bv/bh: (1, D),  wv/wh: (D, D)
    o_ref : (1, Rn, T, D)        output (heads concatenated on lanes)
    """
    if has_mask:
        (qp_ref, kp_ref, v_ref, m_ref,
         wq_ref, bq_ref, wk_ref, bk_ref,
         wv_ref, bv_ref, wh_ref, bh_ref, o_ref) = refs
    else:
        (qp_ref, kp_ref, v_ref,
         wq_ref, bq_ref, wk_ref, bk_ref,
         wv_ref, bv_ref, wh_ref, bh_ref, o_ref) = refs
        m_ref = None

    D = nb_head * d_k
    inv_sqrt_dk = 1.0 / math.sqrt(d_k)

    # ---- im2col temporal conv: one matmul with K = ks*D ----
    def temporal_conv(xp_ref, w_ref, b_ref, t_out):
        xp = xp_ref[0].astype(compute_dtype)                  # (Rn, t_out+ks-1, D)
        x_cat = jnp.concatenate([xp[:, j:j + t_out, :] for j in range(ks)],
                                axis=-1)                      # (Rn, t_out, ks*D)
        x_cat = x_cat.reshape(rn * t_out, ks * D)
        y = jnp.dot(x_cat, w_ref[...].astype(compute_dtype),
                    preferred_element_type=jnp.float32)
        return y + b_ref[...].astype(jnp.float32)             # (Rn*t_out, D) f32

    # 1/sqrt(d_k) folded into q once (applies to q @ k^T identically).
    q = temporal_conv(qp_ref, wq_ref, bq_ref, t_q) * inv_sqrt_dk
    k = temporal_conv(kp_ref, wk_ref, bk_ref, t_k)

    # ---- V projection (big-M matmul) ----
    v2 = v_ref[0].reshape(rn * t_q, D).astype(compute_dtype)
    vp = (jnp.dot(v2, wv_ref[...].astype(compute_dtype),
                  preferred_element_type=jnp.float32)
          + bv_ref[...].astype(jnp.float32))                  # (Rn*T, D) f32

    q3 = q.reshape(rn, t_q, D)
    k3 = k.reshape(rn, t_k, D)
    v3 = vp.reshape(rn, t_k, D)   # t_k == t_q for odd kernel_size (asserted)

    if has_mask:
        bias = m_ref[0][None, :, :]                           # (1, T, T2) f32

    # ---- per-head attention, batched over the Rn node rows ----
    head_outs = []
    for hh in range(nb_head):                                 # static unroll
        lo = hh * d_k
        hi = lo + d_k
        qh = q3[:, :, lo:hi].astype(compute_dtype)            # (Rn, T,  dk)
        kh = k3[:, :, lo:hi].astype(compute_dtype)            # (Rn, T2, dk)
        vh = v3[:, :, lo:hi].astype(compute_dtype)            # (Rn, T2, dk)

        # scores = qh @ kh^T (node rows as batch dim)
        s = lax.dot_general(qh, kh, (((2,), (2,)), ((0,), (0,))),
                            preferred_element_type=jnp.float32)
        if has_mask:
            s = s + bias
        # softmax strictly in f32
        s = s - jnp.max(s, axis=-1, keepdims=True)
        p = jnp.exp(s)
        denom = jnp.sum(p, axis=-1, keepdims=True)
        p = p * pl.reciprocal(denom, approx=False)
        head_outs.append(
            lax.dot_general(p.astype(compute_dtype), vh,
                            (((2,), (1,)), ((0,), (0,))),
                            preferred_element_type=jnp.float32))

    x = jnp.concatenate(head_outs, axis=-1).reshape(rn * t_q, D)

    # ---- output projection (big-M matmul) ----
    out = (jnp.dot(x.astype(compute_dtype), wh_ref[...].astype(compute_dtype),
                   preferred_element_type=jnp.float32)
           + bh_ref[...].astype(jnp.float32))
    o_ref[0] = out.reshape(rn, t_q, D).astype(o_ref.dtype)


# ------------------------------ module wrapper --------------------------------

class MultiHeadAttentionAwareTemporalContexQcK1d:
    """JAX/Pallas port of MultiHeadAttentionAwareTemporalContex_qc_k1d.

    Parameters are deterministic synthetic initializations (not a checkpoint).
    Conv weights stored as (taps, Cin, Cout); linear weights as (Din, Dout),
    y = x @ W + b.  dropout must be 0.0 (inference semantics).
    """

    def __init__(self, nb_head, d_model, kernel_size=3, dropout=0.0,
                 compute_dtype=jnp.float32, rows_per_block=None, key=None):
        assert d_model % nb_head == 0
        assert kernel_size % 2 == 1, "even kernel_size breaks 'same'-conv parity"
        assert dropout == 0.0  # TODO(synk): training-mode dropout not implemented
        self.d_k = d_model // nb_head
        self.h = nb_head
        self.d_model = d_model
        self.kernel_size = kernel_size
        self.causal_padding = kernel_size - 1
        self.padding_1D = (kernel_size - 1) // 2
        self.compute_dtype = compute_dtype     # bf16 recommended on v6e/v7x
        self.rows_per_block = rows_per_block   # None -> auto (target Rn*T >= 256)

        key = jax.random.PRNGKey(0) if key is None else key
        kk = jax.random.split(key, 8)
        D = d_model
        self.wq = 0.1 * jax.random.normal(kk[0], (kernel_size, D, D), jnp.float32)
        self.bq = 0.1 * jax.random.normal(kk[1], (1, D), jnp.float32)
        self.wk = 0.1 * jax.random.normal(kk[2], (kernel_size, D, D), jnp.float32)
        self.bk = 0.1 * jax.random.normal(kk[3], (1, D), jnp.float32)
        self.wv = 0.1 * jax.random.normal(kk[4], (D, D), jnp.float32)
        self.bv = 0.1 * jax.random.normal(kk[5], (1, D), jnp.float32)
        self.wh = 0.1 * jax.random.normal(kk[6], (D, D), jnp.float32)
        self.bh = 0.1 * jax.random.normal(kk[7], (1, D), jnp.float32)

        # Im2col weight reshape + compute-dtype pre-cast done ONCE here
        # (biases stay f32 — they are added post-accumulation).
        self.wq_cat = self.wq.reshape(kernel_size * D, D).astype(compute_dtype)
        self.wk_cat = self.wk.reshape(kernel_size * D, D).astype(compute_dtype)
        self.wv_c = self.wv.astype(compute_dtype)
        self.wh_c = self.wh.astype(compute_dtype)

    def __call__(self, query, key, value, mask=None):
        B, N, T, D = query.shape
        assert D == self.d_model
        out_dtype = query.dtype
        ks = self.kernel_size
        pk = self.padding_1D
        t_k = T + 2 * pk - (ks - 1)   # == T for odd ks

        # ---- choose node rows per grid step ----
        rn = self.rows_per_block
        if rn is None:
            rn = max(1, min(N, _cdiv(256, T)))       # target M = Rn*T >= 256
        rn = max(1, min(rn, N))
        # keep >= 2 parallel grid steps for v7x's 2 TensorCores when possible
        if B * _cdiv(N, rn) < 2 and N > 1:
            rn = _cdiv(N, 2)
        nblk = _cdiv(N, rn)
        Nb = rn * nblk

        def pad_nodes(x):
            if Nb == N:
                return x
            return jnp.pad(x, ((0, 0), (0, Nb - N), (0, 0), (0, 0)))

        qv = pad_nodes(query).astype(self.compute_dtype)
        kv = pad_nodes(key).astype(self.compute_dtype)
        vv = pad_nodes(value).astype(self.compute_dtype)

        # Torch Conv2d(padding=ks-1) + crop of last (ks-1) steps == left-pad by
        # (ks-1) and take a valid conv; key uses 'same' padding (ks-1)//2.
        q_pad = jnp.pad(qv, ((0, 0), (0, 0), (ks - 1, 0), (0, 0)))
        k_pad = jnp.pad(kv, ((0, 0), (0, 0), (pk, pk), (0, 0)))

        has_mask = mask is not None
        if has_mask:
            mbias = jnp.where(mask.reshape(B, T, t_k) == 0,
                              jnp.float32(-1000000000.0),
                              jnp.float32(0.0)).astype(jnp.float32)

        kernel = functools.partial(
            _fused_mhattn_kernel, ks=ks, t_q=T, t_k=t_k, rn=rn,
            nb_head=self.h, d_k=self.d_k,
            compute_dtype=self.compute_dtype, has_mask=has_mask)

        act_specs = [
            pl.BlockSpec((1, rn, T + ks - 1, D), lambda b, nb: (b, nb, 0, 0)),
            pl.BlockSpec((1, rn, T + 2 * pk, D), lambda b, nb: (b, nb, 0, 0)),
            pl.BlockSpec((1, rn, T, D), lambda b, nb: (b, nb, 0, 0)),
        ]
        mask_specs = ([pl.BlockSpec((1, T, t_k), lambda b, nb: (b, 0, 0))]
                      if has_mask else [])
        # weights: constant index_maps -> resident in VMEM across grid steps
        w_specs = [
            pl.BlockSpec((ks * D, D), lambda b, nb: (0, 0)),   # wq (im2col)
            pl.BlockSpec((1, D), lambda b, nb: (0, 0)),        # bq
            pl.BlockSpec((ks * D, D), lambda b, nb: (0, 0)),   # wk (im2col)
            pl.BlockSpec((1, D), lambda b, nb: (0, 0)),        # bk
            pl.BlockSpec((D, D), lambda b, nb: (0, 0)),        # wv
            pl.BlockSpec((1, D), lambda b, nb: (0, 0)),        # bv
            pl.BlockSpec((D, D), lambda b, nb: (0, 0)),        # wh
            pl.BlockSpec((1, D), lambda b, nb: (0, 0)),        # bh
        ]
        args = ([q_pad, k_pad, vv]
                + ([mbias] if has_mask else [])
                + [self.wq_cat, self.bq, self.wk_cat, self.bk,
                   self.wv_c, self.bv, self.wh_c, self.bh])

        out = pl.pallas_call(
            kernel,
            out_shape=jax.ShapeDtypeStruct((B, Nb, T, D), out_dtype),
            grid=(B, nblk),
            in_specs=act_specs + mask_specs + w_specs,
            out_specs=pl.BlockSpec((1, rn, T, D), lambda b, nb: (b, nb, 0, 0)),
            compiler_params=pltpu.CompilerParams(
                dimension_semantics=("parallel", "parallel")),
        )(*args)

        if Nb != N:
            out = out[:, :N]
        return out


# --------------------------- pure-JAX reference -------------------------------

def ref_forward(mod, query, key, value, mask=None):
    B, N, T, D = query.shape
    h, dk, ks, pk = mod.h, mod.d_k, mod.kernel_size, mod.padding_1D
    t_k = T + 2 * pk - (ks - 1)

    def conv(x_pad, w, b, t_out):
        out = sum(jnp.einsum('rtc,cd->rtd', x_pad[:, j:j + t_out, :], w[j])
                  for j in range(ks))
        return out + b[None]

    q2 = query.reshape(B * N, T, D)
    k2 = key.reshape(B * N, T, D)
    q = conv(jnp.pad(q2, ((0, 0), (ks - 1, 0), (0, 0))), mod.wq, mod.bq, T)
    k = conv(jnp.pad(k2, ((0, 0), (pk, pk), (0, 0))), mod.wk, mod.bk, t_k)
    v = value.reshape(B * N * T, D) @ mod.wv + mod.bv

    qh = q.reshape(B, N, T, h, dk).transpose(0, 1, 3, 2, 4)
    kh = k.reshape(B, N, t_k, h, dk).transpose(0, 1, 3, 2, 4)
    vh = v.reshape(B, N, T, h, dk).transpose(0, 1, 3, 2, 4)
    scores = jnp.einsum('bnhtd,bnhsd->bnhts', qh, kh) / math.sqrt(dk)
    if mask is not None:
        m5 = mask.reshape(B, 1, 1, T, t_k)
        scores = jnp.where(m5 == 0, -1000000000.0, scores)
    p = jax.nn.softmax(scores, axis=-1)
    x = jnp.einsum('bnhts,bnhsd->bnhtd', p, vh)
    x = x.transpose(0, 1, 3, 2, 4).reshape(B, N, T, D)
    return (x.reshape(-1, D) @ mod.wh + mod.bh).reshape(B, N, T, D)


# ----------------------------------- main --------------------------------------

if __name__ == "__main__":
    B, N, T = 2, 3, 8
    d_model, nb_head = 32, 4
    kernel_size = 3

    rk = jax.random.PRNGKey(0)
    kq, kk, kv = jax.random.split(rk, 3)
    query = jax.random.normal(kq, (B, N, T, d_model), jnp.float32)
    key_in = jax.random.normal(kk, (B, N, T, d_model), jnp.float32)
    value = jax.random.normal(kv, (B, N, T, d_model), jnp.float32)
    mask = jnp.broadcast_to(jnp.tril(jnp.ones((T, T), jnp.float32))[None],
                            (B, T, T))  # (B, T, T) causal mask

    mod = MultiHeadAttentionAwareTemporalContexQcK1d(
        nb_head, d_model, kernel_size, dropout=0.0,
        compute_dtype=jnp.float32,   # use jnp.bfloat16 on v6e/v7x for MXU speed
        key=jax.random.PRNGKey(1))

    out = jax.block_until_ready(mod(query, key_in, value, mask))
    assert out.shape == (B, N, T, d_model)

    ref = ref_forward(mod, query, key_in, value, mask)
    max_err = float(jnp.abs(out - ref).max())
    assert jnp.allclose(out, ref, atol=1e-3, rtol=1e-3), max_err

    # also exercise the mask=None specialization (no mask DMA / no bias add)
    out_nm = jax.block_until_ready(mod(query, key_in, value, None))
    ref_nm = ref_forward(mod, query, key_in, value, None)
    assert jnp.allclose(out_nm, ref_nm, atol=1e-3, rtol=1e-3)

    print("KERNEL_OK")
</pallas_src>

<mosaic_0001>
module attributes {stable_mosaic.version = 11 : i64} {
  func.func @_fused_mhattn_kernel(%arg0: i32, %arg1: i32, %arg2: memref<1x3x10x32xf32, #tpu.memory_space<vmem>>, %arg3: memref<1x3x10x32xf32, #tpu.memory_space<vmem>>, %arg4: memref<1x3x8x32xf32, #tpu.memory_space<vmem>>, %arg5: memref<1x8x8xf32, #tpu.memory_space<vmem>>, %arg6: memref<96x32xf32, #tpu.memory_space<vmem>>, %arg7: memref<1x32xf32, #tpu.memory_space<vmem>>, %arg8: memref<96x32xf32, #tpu.memory_space<vmem>>, %arg9: memref<1x32xf32, #tpu.memory_space<vmem>>, %arg10: memref<32x32xf32, #tpu.memory_space<vmem>>, %arg11: memref<1x32xf32, #tpu.memory_space<vmem>>, %arg12: memref<32x32xf32, #tpu.memory_space<vmem>>, %arg13: memref<1x32xf32, #tpu.memory_space<vmem>>, %arg14: memref<1x3x8x32xf32, #tpu.memory_space<vmem>>) attributes {dimension_semantics = [#tpu.dimension_semantics<parallel>, #tpu.dimension_semantics<parallel>], iteration_bounds = array<i64: 2, 1>, scalar_prefetch = 0 : i64, scratch_operands = 0 : i64, tpu.core_type = #tpu.core_type<tc>, window_params = [{transform_indices = @transform_0, window_bounds = array<i64: 1, 3, 10, 32>}, {transform_indices = @transform_1, window_bounds = array<i64: 1, 3, 10, 32>}, {transform_indices = @transform_2, window_bounds = array<i64: 1, 3, 8, 32>}, {transform_indices = @transform_3, window_bounds = array<i64: 1, 8, 8>}, {pipeline_mode = #tpu.pipeline_mode<synchronous>, transform_indices = @transform_4, window_bounds = array<i64: 96, 32>}, {pipeline_mode = #tpu.pipeline_mode<synchronous>, transform_indices = @transform_5, window_bounds = array<i64: 1, 32>}, {pipeline_mode = #tpu.pipeline_mode<synchronous>, transform_indices = @transform_6, window_bounds = array<i64: 96, 32>}, {pipeline_mode = #tpu.pipeline_mode<synchronous>, transform_indices = @transform_7, window_bounds = array<i64: 1, 32>}, {pipeline_mode = #tpu.pipeline_mode<synchronous>, transform_indices = @transform_8, window_bounds = array<i64: 32, 32>}, {pipeline_mode = #tpu.pipeline_mode<synchronous>, transform_indices = @transform_9, window_bounds = array<i64: 1, 32>}, {pipeline_mode = #tpu.pipeline_mode<synchronous>, transform_indices = @transform_10, window_bounds = array<i64: 32, 32>}, {pipeline_mode = #tpu.pipeline_mode<synchronous>, transform_indices = @transform_11, window_bounds = array<i64: 1, 32>}, {transform_indices = @transform_12, window_bounds = array<i64: 1, 3, 8, 32>}]} {
    %c0 = arith.constant 0 : index
    %c0_0 = arith.constant 0 : index
    %c0_1 = arith.constant 0 : index
    %c0_2 = arith.constant 0 : index
    %0 = vector.load %arg2[%c0, %c0_0, %c0_1, %c0_2] : memref<1x3x10x32xf32, #tpu.memory_space<vmem>>, vector<1x3x10x32xf32>
    %1 = vector.shape_cast %0 : vector<1x3x10x32xf32> to vector<3x10x32xf32>
    %2 = vector.extract_strided_slice %1 {offsets = [0, 0, 0], sizes = [3, 8, 32], strides = [1, 1, 1]} : vector<3x10x32xf32> to vector<3x8x32xf32>
    %3 = vector.extract_strided_slice %1 {offsets = [0, 1, 0], sizes = [3, 8, 32], strides = [1, 1, 1]} : vector<3x10x32xf32> to vector<3x8x32xf32>
    %4 = vector.extract_strided_slice %1 {offsets = [0, 2, 0], sizes = [3, 8, 32], strides = [1, 1, 1]} : vector<3x10x32xf32> to vector<3x8x32xf32>
    %5 = tpu.concatenate %2, %3, %4 in 2 : vector<3x8x32xf32>, vector<3x8x32xf32>, vector<3x8x32xf32> -> vector<3x8x96xf32>
    %6 = vector.shape_cast %5 : vector<3x8x96xf32> to vector<24x96xf32>
    %c0_3 = arith.constant 0 : index
    %c0_4 = arith.constant 0 : index
    %7 = vector.load %arg6[%c0_3, %c0_4] : memref<96x32xf32, #tpu.memory_space<vmem>>, vector<96x32xf32>
    %cst = arith.constant dense<0.000000e+00> : vector<24x32xf32>
    %8 = tpu.matmul %6, %7, %cst {dimension_numbers = #tpu.dot_dimension_numbers<[1], [0], [0], [1], [0, 0, 1, 1], [], []>} : vector<24x96xf32>, vector<96x32xf32>, vector<24x32xf32> -> vector<24x32xf32>
    %c0_5 = arith.constant 0 : index
    %c0_6 = arith.constant 0 : index
    %9 = vector.load %arg7[%c0_5, %c0_6] : memref<1x32xf32, #tpu.memory_space<vmem>>, vector<1x32xf32>
    %10 = vector.broadcast %9 : vector<1x32xf32> to vector<24x32xf32>
    %11 = arith.addf %8, %10 : vector<24x32xf32>
    %cst_7 = arith.constant 0.353553385 : f32
    %12 = vector.broadcast %cst_7 : f32 to vector<24x32xf32>
    %13 = arith.mulf %11, %12 : vector<24x32xf32>
    %c0_8 = arith.constant 0 : index
    %c0_9 = arith.constant 0 : index
    %c0_10 = arith.constant 0 : index
    %c0_11 = arith.constant 0 : index
    %14 = vector.load %arg3[%c0_8, %c0_9, %c0_10, %c0_11] : memref<1x3x10x32xf32, #tpu.memory_space<vmem>>, vector<1x3x10x32xf32>
    %15 = vector.shape_cast %14 : vector<1x3x10x32xf32> to vector<3x10x32xf32>
    %16 = vector.extract_strided_slice %15 {offsets = [0, 0, 0], sizes = [3, 8, 32], strides = [1, 1, 1]} : vector<3x10x32xf32> to vector<3x8x32xf32>
    %17 = vector.extract_strided_slice %15 {offsets = [0, 1, 0], sizes = [3, 8, 32], strides = [1, 1, 1]} : vector<3x10x32xf32> to vector<3x8x32xf32>
    %18 = vector.extract_strided_slice %15 {offsets = [0, 2, 0], sizes = [3, 8, 32], strides = [1, 1, 1]} : vector<3x10x32xf32> to vector<3x8x32xf32>
    %19 = tpu.concatenate %16, %17, %18 in 2 : vector<3x8x32xf32>, vector<3x8x32xf32>, vector<3x8x32xf32> -> vector<3x8x96xf32>
    %20 = vector.shape_cast %19 : vector<3x8x96xf32> to vector<24x96xf32>
    %c0_12 = arith.constant 0 : index
    %c0_13 = arith.constant 0 : index
    %21 = vector.load %arg8[%c0_12, %c0_13] : memref<96x32xf32, #tpu.memory_space<vmem>>, vector<96x32xf32>
    %cst_14 = arith.constant dense<0.000000e+00> : vector<24x32xf32>
    %22 = tpu.matmul %20, %21, %cst_14 {dimension_numbers = #tpu.dot_dimension_numbers<[1], [0], [0], [1], [0, 0, 1, 1], [], []>} : vector<24x96xf32>, vector<96x32xf32>, vector<24x32xf32> -> vector<24x32xf32>
    %c0_15 = arith.constant 0 : index
    %c0_16 = arith.constant 0 : index
    %23 = vector.load %arg9[%c0_15, %c0_16] : memref<1x32xf32, #tpu.memory_space<vmem>>, vector<1x32xf32>
    %24 = vector.broadcast %23 : vector<1x32xf32> to vector<24x32xf32>
    %25 = arith.addf %22, %24 : vector<24x32xf32>
    %c0_17 = arith.constant 0 : index
    %c0_18 = arith.constant 0 : index
    %c0_19 = arith.constant 0 : index
    %c0_20 = arith.constant 0 : index
    %26 = vector.load %arg4[%c0_17, %c0_18, %c0_19, %c0_20] : memref<1x3x8x32xf32, #tpu.memory_space<vmem>>, vector<1x3x8x32xf32>
    %27 = vector.shape_cast %26 : vector<1x3x8x32xf32> to vector<3x8x32xf32>
    %28 = vector.shape_cast %27 : vector<3x8x32xf32> to vector<24x32xf32>
    %c0_21 = arith.constant 0 : index
    %c0_22 = arith.constant 0 : index
    %29 = vector.load %arg10[%c0_21, %c0_22] : memref<32x32xf32, #tpu.memory_space<vmem>>, vector<32x32xf32>
    %cst_23 = arith.constant dense<0.000000e+00> : vector<24x32xf32>
    %30 = tpu.matmul %28, %29, %cst_23 {dimension_numbers = #tpu.dot_dimension_numbers<[1], [0], [0], [1], [0, 0, 1, 1], [], []>} : vector<24x32xf32>, vector<32x32xf32>, vector<24x32xf32> -> vector<24x32xf32>
    %c0_24 = arith.constant 0 : index
    %c0_25 = arith.constant 0 : index
    %31 = vector.load %arg11[%c0_24, %c0_25] : memref<1x32xf32, #tpu.memory_space<vmem>>, vector<1x32xf32>
    %32 = vector.broadcast %31 : vector<1x32xf32> to vector<24x32xf32>
    %33 = arith.addf %30, %32 : vector<24x32xf32>
    %34 = vector.shape_cast %13 : vector<24x32xf32> to vector<3x8x32xf32>
    %35 = vector.shape_cast %25 : vector<24x32xf32> to vector<3x8x32xf32>
    %36 = vector.shape_cast %33 : vector<24x32xf32> to vector<3x8x32xf32>
    %c0_26 = arith.constant 0 : index
    %c0_27 = arith.constant 0 : index
    %c0_28 = arith.constant 0 : index
    %37 = vector.load %arg5[%c0_26, %c0_27, %c0_28] : memref<1x8x8xf32, #tpu.memory_space<vmem>>, vector<1x8x8xf32>
    %38 = vector.shape_cast %37 : vector<1x8x8xf32> to vector<8x8xf32>
    %39 = vector.shape_cast %38 : vector<8x8xf32> to vector<1x8x8xf32>
    %40 = vector.extract_strided_slice %34 {offsets = [0, 0, 0], sizes = [3, 8, 8], strides = [1, 1, 1]} : vector<3x8x32xf32> to vector<3x8x8xf32>
    %41 = vector.extract_strided_slice %35 {offsets = [0, 0, 0], sizes = [3, 8, 8], strides = [1, 1, 1]} : vector<3x8x32xf32> to vector<3x8x8xf32>
    %42 = vector.extract_strided_slice %36 {offsets = [0, 0, 0], sizes = [3, 8, 8], strides = [1, 1, 1]} : vector<3x8x32xf32> to vector<3x8x8xf32>
    %cst_29 = arith.constant dense<0.000000e+00> : vector<3x8x8xf32>
    %43 = tpu.matmul %40, %41, %cst_29 {dimension_numbers = #tpu.dot_dimension_numbers<[2], [2], [1], [1], [0, 0, 0, 1, 1, 1], [0], [0]>} : vector<3x8x8xf32>, vector<3x8x8xf32>, vector<3x8x8xf32> -> vector<3x8x8xf32>
    %44 = vector.broadcast %39 : vector<1x8x8xf32> to vector<3x8x8xf32>
    %45 = arith.addf %43, %44 : vector<3x8x8xf32>
    %cst_30 = arith.constant dense<0xFF800000> : vector<3x8xf32>
    %46 = vector.multi_reduction <maximumf>, %45, %cst_30 [2] : vector<3x8x8xf32> to vector<3x8xf32>
    %47 = vector.shape_cast %46 : vector<3x8xf32> to vector<3x8x1xf32>
    %48 = vector.broadcast %47 : vector<3x8x1xf32> to vector<3x8x8xf32>
    %49 = arith.subf %45, %48 : vector<3x8x8xf32>
    %50 = math.exp %49 : vector<3x8x8xf32>
    %cst_31 = arith.constant dense<0.000000e+00> : vector<3x8xf32>
    %51 = vector.multi_reduction <add>, %50, %cst_31 [2] : vector<3x8x8xf32> to vector<3x8xf32>
    %52 = vector.shape_cast %51 : vector<3x8xf32> to vector<3x8x1xf32>
    %53 = tpu.reciprocal %52 : vector<3x8x1xf32> -> vector<3x8x1xf32>
    %54 = vector.broadcast %53 : vector<3x8x1xf32> to vector<3x8x8xf32>
    %55 = arith.mulf %50, %54 : vector<3x8x8xf32>
    %cst_32 = arith.constant dense<0.000000e+00> : vector<3x8x8xf32>
    %56 = tpu.matmul %55, %42, %cst_32 {dimension_numbers = #tpu.dot_dimension_numbers<[2], [1], [1], [2], [0, 0, 0, 1, 1, 2], [0], [0]>} : vector<3x8x8xf32>, vector<3x8x8xf32>, vector<3x8x8xf32> -> vector<3x8x8xf32>
    %57 = vector.extract_strided_slice %34 {offsets = [0, 0, 8], sizes = [3, 8, 8], strides = [1, 1, 1]} : vector<3x8x32xf32> to vector<3x8x8xf32>
    %58 = vector.extract_strided_slice %35 {offsets = [0, 0, 8], sizes = [3, 8, 8], strides = [1, 1, 1]} : vector<3x8x32xf32> to vector<3x8x8xf32>
    %59 = vector.extract_strided_slice %36 {offsets = [0, 0, 8], sizes = [3, 8, 8], strides = [1, 1, 1]} : vector<3x8x32xf32> to vector<3x8x8xf32>
    %cst_33 = arith.constant dense<0.000000e+00> : vector<3x8x8xf32>
    %60 = tpu.matmul %57, %58, %cst_33 {dimension_numbers = #tpu.dot_dimension_numbers<[2], [2], [1], [1], [0, 0, 0, 1, 1, 1], [0], [0]>} : vector<3x8x8xf32>, vector<3x8x8xf32>, vector<3x8x8xf32> -> vector<3x8x8xf32>
    %61 = vector.broadcast %39 : vector<1x8x8xf32> to vector<3x8x8xf32>
    %62 = arith.addf %60, %61 : vector<3x8x8xf32>
    %cst_34 = arith.constant dense<0xFF800000> : vector<3x8xf32>
    %63 = vector.multi_reduction <maximumf>, %62, %cst_34 [2] : vector<3x8x8xf32> to vector<3x8xf32>
    %64 = vector.shape_cast %63 : vector<3x8xf32> to vector<3x8x1xf32>
    %65 = vector.broadcast %64 : vector<3x8x1xf32> to vector<3x8x8xf32>
    %66 = arith.subf %62, %65 : vector<3x8x8xf32>
    %67 = math.exp %66 : vector<3x8x8xf32>
    %cst_35 = arith.constant dense<0.000000e+00> : vector<3x8xf32>
    %68 = vector.multi_reduction <add>, %67, %cst_35 [2] : vector<3x8x8xf32> to vector<3x8xf32>
    %69 = vector.shape_cast %68 : vector<3x8xf32> to vector<3x8x1xf32>
    %70 = tpu.reciprocal %69 : vector<3x8x1xf32> -> vector<3x8x1xf32>
    %71 = vector.broadcast %70 : vector<3x8x1xf32> to vector<3x8x8xf32>
    %72 = arith.mulf %67, %71 : vector<3x8x8xf32>
    %cst_36 = arith.constant dense<0.000000e+00> : vector<3x8x8xf32>
    %73 = tpu.matmul %72, %59, %cst_36 {dimension_numbers = #tpu.dot_dimension_numbers<[2], [1], [1], [2], [0, 0, 0, 1, 1, 2], [0], [0]>} : vector<3x8x8xf32>, vector<3x8x8xf32>, vector<3x8x8xf32> -> vector<3x8x8xf32>
    %74 = vector.extract_strided_slice %34 {offsets = [0, 0, 16], sizes = [3, 8, 8], strides = [1, 1, 1]} : vector<3x8x32xf32> to vector<3x8x8xf32>
    %75 = vector.extract_strided_slice %35 {offsets = [0, 0, 16], sizes = [3, 8, 8], strides = [1, 1, 1]} : vector<3x8x32xf32> to vector<3x8x8xf32>
    %76 = vector.extract_strided_slice %36 {offsets = [0, 0, 16], sizes = [3, 8, 8], strides = [1, 1, 1]} : vector<3x8x32xf32> to vector<3x8x8xf32>
    %cst_37 = arith.constant dense<0.000000e+00> : vector<3x8x8xf32>
    %77 = tpu.matmul %74, %75, %cst_37 {dimension_numbers = #tpu.dot_dimension_numbers<[2], [2], [1], [1], [0, 0, 0, 1, 1, 1], [0], [0]>} : vector<3x8x8xf32>, vector<3x8x8xf32>, vector<3x8x8xf32> -> vector<3x8x8xf32>
    %78 = vector.broadcast %39 : vector<1x8x8xf32> to vector<3x8x8xf32>
    %79 = arith.addf %77, %78 : vector<3x8x8xf32>
    %cst_38 = arith.constant dense<0xFF800000> : vector<3x8xf32>
    %80 = vector.multi_reduction <maximumf>, %79, %cst_38 [2] : vector<3x8x8xf32> to vector<3x8xf32>
    %81 = vector.shape_cast %80 : vector<3x8xf32> to vector<3x8x1xf32>
    %82 = vector.broadcast %81 : vector<3x8x1xf32> to vector<3x8x8xf32>
    %83 = arith.subf %79, %82 : vector<3x8x8xf32>
    %84 = math.exp %83 : vector<3x8x8xf32>
    %cst_39 = arith.constant dense<0.000000e+00> : vector<3x8xf32>
    %85 = vector.multi_reduction <add>, %84, %cst_39 [2] : vector<3x8x8xf32> to vector<3x8xf32>
    %86 = vector.shape_cast %85 : vector<3x8xf32> to vector<3x8x1xf32>
    %87 = tpu.reciprocal %86 : vector<3x8x1xf32> -> vector<3x8x1xf32>
    %88 = vector.broadcast %87 : vector<3x8x1xf32> to vector<3x8x8xf32>
    %89 = arith.mulf %84, %88 : vector<3x8x8xf32>
    %cst_40 = arith.constant dense<0.000000e+00> : vector<3x8x8xf32>
    %90 = tpu.matmul %89, %76, %cst_40 {dimension_numbers = #tpu.dot_dimension_numbers<[2], [1], [1], [2], [0, 0, 0, 1, 1, 2], [0], [0]>} : vector<3x8x8xf32>, vector<3x8x8xf32>, vector<3x8x8xf32> -> vector<3x8x8xf32>
    %91 = vector.extract_strided_slice %34 {offsets = [0, 0, 24], sizes = [3, 8, 8], strides = [1, 1, 1]} : vector<3x8x32xf32> to vector<3x8x8xf32>
    %92 = vector.extract_strided_slice %35 {offsets = [0, 0, 24], sizes = [3, 8, 8], strides = [1, 1, 1]} : vector<3x8x32xf32> to vector<3x8x8xf32>
    %93 = vector.extract_strided_slice %36 {offsets = [0, 0, 24], sizes = [3, 8, 8], strides = [1, 1, 1]} : vector<3x8x32xf32> to vector<3x8x8xf32>
    %cst_41 = arith.constant dense<0.000000e+00> : vector<3x8x8xf32>
    %94 = tpu.matmul %91, %92, %cst_41 {dimension_numbers = #tpu.dot_dimension_numbers<[2], [2], [1], [1], [0, 0, 0, 1, 1, 1], [0], [0]>} : vector<3x8x8xf32>, vector<3x8x8xf32>, vector<3x8x8xf32> -> vector<3x8x8xf32>
    %95 = vector.broadcast %39 : vector<1x8x8xf32> to vector<3x8x8xf32>
    %96 = arith.addf %94, %95 : vector<3x8x8xf32>
    %cst_42 = arith.constant dense<0xFF800000> : vector<3x8xf32>
    %97 = vector.multi_reduction <maximumf>, %96, %cst_42 [2] : vector<3x8x8xf32> to vector<3x8xf32>
    %98 = vector.shape_cast %97 : vector<3x8xf32> to vector<3x8x1xf32>
    %99 = vector.broadcast %98 : vector<3x8x1xf32> to vector<3x8x8xf32>
    %100 = arith.subf %96, %99 : vector<3x8x8xf32>
    %101 = math.exp %100 : vector<3x8x8xf32>
    %cst_43 = arith.constant dense<0.000000e+00> : vector<3x8xf32>
    %102 = vector.multi_reduction <add>, %101, %cst_43 [2] : vector<3x8x8xf32> to vector<3x8xf32>
    %103 = vector.shape_cast %102 : vector<3x8xf32> to vector<3x8x1xf32>
    %104 = tpu.reciprocal %103 : vector<3x8x1xf32> -> vector<3x8x1xf32>
    %105 = vector.broadcast %104 : vector<3x8x1xf32> to vector<3x8x8xf32>
    %106 = arith.mulf %101, %105 : vector<3x8x8xf32>
    %cst_44 = arith.constant dense<0.000000e+00> : vector<3x8x8xf32>
    %107 = tpu.matmul %106, %93, %cst_44 {dimension_numbers = #tpu.dot_dimension_numbers<[2], [1], [1], [2], [0, 0, 0, 1, 1, 2], [0], [0]>} : vector<3x8x8xf32>, vector<3x8x8xf32>, vector<3x8x8xf32> -> vector<3x8x8xf32>
    %108 = tpu.concatenate %56, %73, %90, %107 in 2 : vector<3x8x8xf32>, vector<3x8x8xf32>, vector<3x8x8xf32>, vector<3x8x8xf32> -> vector<3x8x32xf32>
    %109 = vector.shape_cast %108 : vector<3x8x32xf32> to vector<24x32xf32>
    %c0_45 = arith.constant 0 : index
    %c0_46 = arith.constant 0 : index
    %110 = vector.load %arg12[%c0_45, %c0_46] : memref<32x32xf32, #tpu.memory_space<vmem>>, vector<32x32xf32>
    %cst_47 = arith.constant dense<0.000000e+00> : vector<24x32xf32>
    %111 = tpu.matmul %109, %110, %cst_47 {dimension_numbers = #tpu.dot_dimension_numbers<[1], [0], [0], [1], [0, 0, 1, 1], [], []>} : vector<24x32xf32>, vector<32x32xf32>, vector<24x32xf32> -> vector<24x32xf32>
    %c0_48 = arith.constant 0 : index
    %c0_49 = arith.constant 0 : index
    %112 = vector.load %arg13[%c0_48, %c0_49] : memref<1x32xf32, #tpu.memory_space<vmem>>, vector<1x32xf32>
    %113 = vector.broadcast %112 : vector<1x32xf32> to vector<24x32xf32>
    %114 = arith.addf %111, %113 : vector<24x32xf32>
    %115 = vector.shape_cast %114 : vector<24x32xf32> to vector<3x8x32xf32>
    %c0_50 = arith.constant 0 : index
    %c0_51 = arith.constant 0 : index
    %c0_52 = arith.constant 0 : index
    %c0_53 = arith.constant 0 : index
    %116 = vector.load %arg14[%c0_50, %c0_51, %c0_52, %c0_53] : memref<1x3x8x32xf32, #tpu.memory_space<vmem>>, vector<1x3x8x32xf32>
    %117 = vector.shape_cast %116 : vector<1x3x8x32xf32> to vector<3x8x32xf32>
    %118 = vector.shape_cast %115 : vector<3x8x32xf32> to vector<1x3x8x32xf32>
    tpu.vector_store %arg14[%c0_50, %c0_51, %c0_52, %c0_53], %118 {strides = array<i32>} : memref<1x3x8x32xf32, #tpu.memory_space<vmem>>, vector<1x3x8x32xf32>,
    return
  }
  func.func @transform_0(%arg0: i32, %arg1: i32) -> (i32, i32, i32, i32) {
    %c0_i32 = arith.constant 0 : i32
    %c0_i32_0 = arith.constant 0 : i32
    %c0_i32_1 = arith.constant 0 : i32
    return %arg0, %arg1, %c0_i32, %c0_i32_0 : i32, i32, i32, i32
  }
  func.func @transform_1(%arg0: i32, %arg1: i32) -> (i32, i32, i32, i32) {
    %c0_i32 = arith.constant 0 : i32
    %c0_i32_0 = arith.constant 0 : i32
    %c0_i32_1 = arith.constant 0 : i32
    return %arg0, %arg1, %c0_i32, %c0_i32_0 : i32, i32, i32, i32
  }
  func.func @transform_2(%arg0: i32, %arg1: i32) -> (i32, i32, i32, i32) {
    %c0_i32 = arith.constant 0 : i32
    %c0_i32_0 = arith.constant 0 : i32
    %c0_i32_1 = arith.constant 0 : i32
    return %arg0, %arg1, %c0_i32, %c0_i32_0 : i32, i32, i32, i32
  }
  func.func @transform_3(%arg0: i32, %arg1: i32) -> (i32, i32, i32) {
    %c0_i32 = arith.constant 0 : i32
    %c0_i32_0 = arith.constant 0 : i32
    %c0_i32_1 = arith.constant 0 : i32
    return %arg0, %c0_i32, %c0_i32_0 : i32, i32, i32
  }
  func.func @transform_4(%arg0: i32, %arg1: i32) -> (i32, i32) {
    %c0_i32 = arith.constant 0 : i32
    %c0_i32_0 = arith.constant 0 : i32
    %c0_i32_1 = arith.constant 0 : i32
    return %c0_i32, %c0_i32_0 : i32, i32
  }
  func.func @transform_5(%arg0: i32, %arg1: i32) -> (i32, i32) {
    %c0_i32 = arith.constant 0 : i32
    %c0_i32_0 = arith.constant 0 : i32
    %c0_i32_1 = arith.constant 0 : i32
    return %c0_i32, %c0_i32_0 : i32, i32
  }
  func.func @transform_6(%arg0: i32, %arg1: i32) -> (i32, i32) {
    %c0_i32 = arith.constant 0 : i32
    %c0_i32_0 = arith.constant 0 : i32
    %c0_i32_1 = arith.constant 0 : i32
    return %c0_i32, %c0_i32_0 : i32, i32
  }
  func.func @transform_7(%arg0: i32, %arg1: i32) -> (i32, i32) {
    %c0_i32 = arith.constant 0 : i32
    %c0_i32_0 = arith.constant 0 : i32
    %c0_i32_1 = arith.constant 0 : i32
    return %c0_i32, %c0_i32_0 : i32, i32
  }
  func.func @transform_8(%arg0: i32, %arg1: i32) -> (i32, i32) {
    %c0_i32 = arith.constant 0 : i32
    %c0_i32_0 = arith.constant 0 : i32
    %c0_i32_1 = arith.constant 0 : i32
    return %c0_i32, %c0_i32_0 : i32, i32
  }
  func.func @transform_9(%arg0: i32, %arg1: i32) -> (i32, i32) {
    %c0_i32 = arith.constant 0 : i32
    %c0_i32_0 = arith.constant 0 : i32
    %c0_i32_1 = arith.constant 0 : i32
    return %c0_i32, %c0_i32_0 : i32, i32
  }
  func.func @transform_10(%arg0: i32, %arg1: i32) -> (i32, i32) {
    %c0_i32 = arith.constant 0 : i32
    %c0_i32_0 = arith.constant 0 : i32
    %c0_i32_1 = arith.constant 0 : i32
    return %c0_i32, %c0_i32_0 : i32, i32
  }
  func.func @transform_11(%arg0: i32, %arg1: i32) -> (i32, i32) {
    %c0_i32 = arith.constant 0 : i32
    %c0_i32_0 = arith.constant 0 : i32
    %c0_i32_1 = arith.constant 0 : i32
    return %c0_i32, %c0_i32_0 : i32, i32
  }
  func.func @transform_12(%arg0: i32, %arg1: i32) -> (i32, i32, i32, i32) {
    %c0_i32 = arith.constant 0 : i32
    %c0_i32_0 = arith.constant 0 : i32
    %c0_i32_1 = arith.constant 0 : i32
    return %arg0, %arg1, %c0_i32, %c0_i32_0 : i32, i32, i32, i32
  }
}

</mosaic_0001>

<bundles_post_ra>
// kernel: tpu_custom_call.1
= control target key start
LH: loop header
LB: loop body
LE: loop exit
PB: predicated region body
PF: predicated region fallthrough
CT: control target
= control target key end

     0   :  { %s4581_s0 = inlined_call_operand.vmem [shape: f32[2,3,10,32], index: 0, kind: input, shape index: {}]   ;;  %s4582_s1 = inlined_call_operand.vmem [shape: f32[2,3,10,32], index: 1, kind: input, shape index: {}]   ;;  %s4583_s2 = inlined_call_operand.vmem [shape: f32[2,3,8,32], index: 2, kind: input, shape index: {}]   ;;  %s4584_s3 = inlined_call_operand.vmem [shape: f32[2,8,8], index: 3, kind: input, shape index: {}]   ;;  %s4585_s4 = inlined_call_operand.vmem [shape: f32[96,32], index: 4, kind: input, shape index: {}]   ;;  %s4586_s5 = inlined_call_operand.vmem [shape: f32[1,32], index: 5, kind: input, shape index: {}]   ;;  %s4587_s6 = inlined_call_operand.vmem [shape: f32[96,32], index: 6, kind: input, shape index: {}]   ;;  %s4588_s7 = inlined_call_operand.vmem [shape: f32[1,32], index: 7, kind: input, shape index: {}]   ;;  %s4589_s8 = inlined_call_operand.vmem [shape: f32[32,32], index: 8, kind: input, shape index: {}]   ;;  %s4590_s9 = inlined_call_operand.vmem [shape: f32[1,32], index: 9, kind: input, shape index: {}]   ;;  %s4591_s10 = inlined_call_operand.vmem [shape: f32[32,32], index: 10, kind: input, shape index: {}]   ;;  %s4592_s11 = inlined_call_operand.vmem [shape: f32[1,32], index: 11, kind: input, shape index: {}]   ;;  %s4593_s12 = inlined_call_operand.hbm [shape: f32[2,3,8,32], index: 12, kind: output, shape index: {}]  }
   0x1   :  { %4598 = sst [smem:[#allocation10_spill]] %s4582_s1 }
   0x2   :  { %17 = vsyncpa [#allocation3], 0 }
   0x3   :  { %19 = vsyncpa [#allocation3 + $0x1], 0  ;;  %s3943_s21 = smov 0   ;;  %s3945_s22 = smov 0  }
   0x4   :  { %s3947_s23 = smov 0   ;;  %s3949_s24 = smov 0  }
   0x5   :  { %s3951_s25 = smov 0   ;;  %s3953_s26 = smov 0  }
   0x6 LB: > { %4599 = sst [smem:[#allocation5_spill]] %s3851_s23  ;;  %s3242_s27 = sadd.s32 4294967295, %s3863_s26   ;;  %s3863_s26 = sphi %s3953_s26, %s25_s26   ;;  %s3859_s25 = sphi %s3951_s25, %s4611_s25   ;;  %s3855_s24 = sphi %s3949_s24, %s4610_s24   ;;  %s3851_s23 = sphi %s3947_s23, %s4609_s23   ;;  %s3847_s22 = sphi %s3945_s22, %s4613_s22   ;;  %s3843_s21 = sphi %s3943_s21, %s4612_s21  }
   0x7   : > { %4600 = sst [smem:[#allocation6_spill]] %s3859_s25  ;;  %s3243_s28 = sadd.s32 4294967294, %s3863_s26  }
   0x8   : > { %s37_s29 = sadd.s32 1, %s3859_s25  ;;  %s324_s30 = sadd.s32 1, %s3851_s23 }
   0x9   : > { %p39_p0 = scmp.ge.s32.totalorder %s37_s29, 2  ;;  %p334_p1 = scmp.ne.s32.totalorder %s3851_s23, %s3847_s22 }
   0xa   : > { %p335_p2 = scmp.eq.s32.totalorder %s3242_s27, 1  ;;  %p340_p3 = scmp.ne.s32.totalorder %s3847_s22, %s3843_s21 }
   0xb   : > { %s4615_s29 = smov (%p39_p0, %s37_s29), 0  ;;  %p341_p5 = scmp.eq.s32.totalorder %s3243_s28, 1 }
   0xc   : > { %4601 = sst [smem:[#allocation7_spill]] %s4615_s29  ;;  %p3983_p4 = por %p335_p2, %p334_p1 }
   0xd   : > { %s319_s14 = ssub.s32 %s3859_s25, %s4615_s29  ;;  %p3246_p6 = scmp.ge.s32.totalorder %s3863_s26, 1 }
   0xe   : > { %p322_p7 = scmp.eq.s32.totalorder %s319_s14, 0  ;;  %p3990_p8 = por %p341_p5, %p340_p3 }
   0xf   : > { %p431_p9 = scmp.lt.s32.totalorder %s3863_s26, 3 }
  0x10   : > { %s4603_s15 = scalar_select %p3990_p8, 1, 0 }
  0x11   : > { %s3996_s16 = scalar_select %p322_p7, %s3851_s23, %s324_s30  }
  0x12   : > { %4604 = sst [smem:[#allocation8_spill]] %s4603_s15  ;;  %p432_p10 = pnand %p3246_p6, %p431_p9 }
  0x13   : > { %4605 = sst [smem:[#allocation9_spill]] %s3996_s16  ;;  %p502_p11 = scmp.lt.s32.totalorder (!%p432_p10), %s3855_s24, 1  ;;  %v762_v0 = vld [vmem:[%s4587_s6] sm:$0xff] (!%p432_p10)  ;;  %v3865_v1 = vmov (!%p432_p10), 0.0|0.0   ;;  %v763_v2 = vld [vmem:[%s4587_s6 + $0x8] sm:$0xff] (!%p432_p10)  ;;  %v764_v7 = vld [vmem:[%s4587_s6 + $0x10] sm:$0xff] (!%p432_p10) }
  0x14   : > { %435 = sbr.rel (%p432_p10) target bundleno = 3169 (0xc61), region = 68  ;;  %3636 = vmatprep.subr.bf16.mxu1 (!%p432_p10), %v3865_v1  ;;  %3618 = vmatprep.subr.bf16.mxu0 (!%p432_p10), %v3865_v1  ;;  %v596_v3 = vld [vmem:[%s4585_s4] sm:$0xff] (!%p432_p10)  ;;  %v597_v4 = vld [vmem:[%s4585_s4 + $0x8] sm:$0xff] (!%p432_p10)  ;;  %v3637_v5 = vpack.c.bf16 (!%p432_p10), %v763_v2, %v762_v0  ;;  %v765_v8 = vld [vmem:[%s4587_s6 + $0x18] sm:$0xff] (!%p432_p10)  ;;  %vm3866_vm0 = vmmov (!%p432_p10), 0   ;;  %v3867_v12 = vmov (!%p432_p10), 0.0  }
  0x15   : > { %v3619_v6 = vpack.c.bf16 (!%p432_p10), %v597_v4, %v596_v3  ;;  %v598_v9 = vld [vmem:[%s4585_s4 + $0x10] sm:$0xff] (!%p432_p10)  ;;  %v599_v10 = vld [vmem:[%s4585_s4 + $0x18] sm:$0xff] (!%p432_p10)  ;;  %v766_v11 = vld [vmem:[%s4587_s6 + $0x20] sm:$0xff] (!%p432_p10)  ;;  %3455 = vmatprep.mubr.msk.f32.mxu1 (!%p432_p10), %vm3866_vm0, %v3867_v12  ;;  %3422 = vmatprep.mubr.msk.f32.mxu0 (!%p432_p10), %vm3866_vm0, %v3867_v12  ;;  %v3640_v13 = vpack.c.bf16 (!%p432_p10), %v765_v8, %v764_v7  ;;  %s4606_s1 = sld [smem:[#allocation10_spill]] (!%p432_p10)  ;;  %vm550_vm1 = vcmask (!%p432_p10), 1046528   ;;  %vm569_vm2 = vcmask (!%p432_p10), 1045504  }
  0x16   : > { %3638 = vmatpush3.bf16.msra.mxu1 (!%p432_p10), %v3637_v5  ;;  %v3622_v14 = vpack.c.bf16 (!%p432_p10), %v599_v10, %v598_v9  ;;  %v767_v15 = vld [vmem:[%s4587_s6 + $0x28] sm:$0xff] (!%p432_p10)  ;;  %v600_v16 = vld [vmem:[%s4585_s4 + $0x20] sm:$0xff] (!%p432_p10)  ;;  %v768_v18 = vld [vmem:[%s4587_s6 + $0x30] sm:$0xff] (!%p432_p10)  ;;  %s3869_s23 = smov (!%p432_p10), 64   ;;  %vm588_vm3 = vcmask (!%p432_p10), 261120   ;;  %vm592_vm4 = vcmask (!%p432_p10), 523264  }
  0x17   : > { %3620 = vmatpush3.bf16.msra.mxu0 (!%p432_p10), %v3619_v6  ;;  %v601_v17 = vld [vmem:[%s4585_s4 + $0x28] sm:$0xff] (!%p432_p10)  ;;  %3639 = vmatprep.subr.bf16.mxu1 (!%p432_p10), %v3865_v1  ;;  %v769_v19 = vld [vmem:[%s4587_s6 + $0x38] sm:$0xff] (!%p432_p10)  ;;  %v602_v20 = vld [vmem:[%s4585_s4 + $0x30] sm:$0xff] (!%p432_p10)  ;;  %v3643_v25 = vpack.c.bf16 (!%p432_p10), %v767_v15, %v766_v11  ;;  %vm615_vm5 = vcmask (!%p432_p10), 785408   ;;  %vm974_vm6 = vcmask (!%p432_p10), 64512   ;;  %s3871_s25 = smov (!%p432_p10), 112  }
  0x18   : > { %3621 = vmatprep.subr.bf16.mxu0 (!%p432_p10), %v3865_v1  ;;  %v603_v21 = vld [vmem:[%s4585_s4 + $0x38] sm:$0xff] (!%p432_p10)  ;;  %v3625_v26 = vpack.c.bf16 (!%p432_p10), %v601_v17, %v600_v16  ;;  %v3646_v44 = vpack.c.bf16 (!%p432_p10), %v769_v19, %v768_v18  ;;  %v770_v46 = vld [vmem:[%s4587_s6 + $0x40] sm:$0xff] (!%p432_p10)  ;;  %v771_v47 = vld [vmem:[%s4587_s6 + $0x48] sm:$0xff] (!%p432_p10)  ;;  %s3872_s18 = smov (!%p432_p10), 104   ;;  %s3874_s16 = smov (!%p432_p10), 8   ;;  %vm2982_vm7 = vcmask (!%p432_p10), 130048  }
  0x19   : > { %v3628_v45 = vpack.c.bf16 (!%p432_p10), %v603_v21, %v602_v20  ;;  %v604_v52 = vld [vmem:[%s4585_s4 + $0x40] sm:$0xff] (!%p432_p10)  ;;  %v605_v53 = vld [vmem:[%s4585_s4 + $0x48] sm:$0xff] (!%p432_p10)  ;;  %v3649_v55 = vpack.c.bf16 (!%p432_p10), %v771_v47, %v770_v46  ;;  %v772_v3 = vld [vmem:[%s4587_s6 + $0x50] sm:$0xff] (!%p432_p10)  ;;  %vm2986_vm8 = vcmask (!%p432_p10), 195584  }
  0x1a   : > { %3641 = vmatpush3.bf16.msra.mxu1 (!%p432_p10), %v3640_v13  ;;  %v3631_v2 = vpack.c.bf16 (!%p432_p10), %v605_v53, %v604_v52  ;;  %v773_v4 = vld [vmem:[%s4587_s6 + $0x58] sm:$0xff] (!%p432_p10)  ;;  %v606_v5 = vld [vmem:[%s4585_s4 + $0x50] sm:$0xff] (!%p432_p10) }
  0x1b   : > { %s4014_s29 = scalar_select %p502_p11, %s3855_s24, 1  ;;  %3623 = vmatpush3.bf16.msra.mxu0 %v3622_v14  ;;  %3642 = vmatprep.subr.bf16.mxu1 %v3865_v1  ;;  %v607_v6 = vld [vmem:[%s4585_s4 + $0x58] sm:$0xff]  ;;  %v3652_v14 = vpack.c.bf16 %v773_v4, %v772_v3 }
  0x1c   : > { %3624 = vmatprep.subr.bf16.mxu0 %v3865_v1  ;;  %v3634_v15 = vpack.c.bf16 %v607_v6, %v606_v5 }
  0x1d   : > { %s3667_s17 = smul.u32 48, %s4014_s29  ;;  %s3250_s30 = sshll.u32 %s4014_s29, 3 }
  0x1e   : > { %3644 = vmatpush3.bf16.msra.mxu1 %v3643_v25 }
  0x1f   : > { %s4050_s14 = scalar_lea.vmem %s4606_s1, %s3667_s17  ;;  %s4055_s19 = scalar_lea.vmem %s4581_s0, %s3667_s17  ;;  %3626 = vmatpush3.bf16.msra.mxu0 %v3625_v26  ;;  %3645 = vmatprep.subr.bf16.mxu1 %v3865_v1 }
  0x20   : > { %v4070_v22 = vld [vmem:[%s4050_s14] sm:$0xff]  ;;  %v709_v23 = vld [vmem:[%s4050_s14 + $0x8] sm:$0x3]  ;;  %v4082_v36 = vld [vmem:[%s4050_s14 + $0x10] sm:$0xff]  ;;  %s3868_s1 = smov 32   ;;  %3627 = vmatprep.subr.bf16.mxu0 %v3865_v1  ;;  %s3876_s17 = smov [#allocation2]  }
  0x21   : > { %v4074_v24 = vld [vmem:[%s4055_s19] sm:$0xff]  ;;  %v720_v27 = vrot.slane %v4070_v22, 1  ;;  %v721_v28 = vrot.slane %v709_v23, 1  ;;  %v738_v29 = vrot.slane %v4070_v22, 2  ;;  %v739_v30 = vrot.slane %v709_v23, 2  ;;  %v4085_v37 = vld [vmem:[%s4055_s19 + $0x10] sm:$0xff] }
  0x22   : > { %v539_v31 = vld [vmem:[%s4055_s19 + $0x8] sm:$0x3]  ;;  %v551_v32 = vrot.slane %v4074_v24, 1  ;;  %v570_v34 = vrot.slane %v4074_v24, 2  ;;  %v711_v40 = vld [vmem:[%s4050_s14 + $0x18] sm:$0x3]  ;;  %3647 = vmatpush3.bf16.msra.mxu1 %v3646_v44 }
  0x23   : > { %v552_v33 = vrot.slane %v539_v31, 1  ;;  %v571_v35 = vrot.slane %v539_v31, 2  ;;  %v722_v38 = vsel %vm550_vm1, %v720_v27, %v721_v28  ;;  %v740_v39 = vsel %vm569_vm2, %v738_v29, %v739_v30  ;;  %v541_v41 = vld [vmem:[%s4055_s19 + $0x18] sm:$0x3]  ;;  %v4114_v54 = vld [vmem:[%s4050_s14 + $0x20] sm:$0xff]  ;;  %3629 = vmatpush3.bf16.msra.mxu0 %v3628_v45  ;;  %3648 = vmatprep.subr.bf16.mxu1 %v3865_v1  ;;  %v874_v30 = vld [vmem:[%s4589_s8 + $0x8] sm:$0xff] }
  0x24   : > { %729 = vrot.lane.b32.xlu0 %v722_v38, %s3868_s1  ;;  %747 = vrot.lane.b32.xlu1 %v740_v39, %s3869_s23  ;;  %v723_v42 = vrot.slane %v4082_v36, 1  ;;  %v554_v43 = vrot.slane %v4085_v37, 1  ;;  %v724_v50 = vrot.slane %v711_v40, 1  ;;  %v555_v51 = vrot.slane %v541_v41, 1  ;;  %v713_v60 = vld [vmem:[%s4050_s14 + $0x28] sm:$0x3] }
  0x25   : > { %v553_v48 = vsel %vm550_vm1, %v551_v32, %v552_v33  ;;  %v572_v49 = vsel %vm569_vm2, %v570_v34, %v571_v35  ;;  %v741_v56 = vrot.slane %v4082_v36, 2  ;;  %v742_v57 = vrot.slane %v711_v40, 2  ;;  %v4124_v63 = vld [vmem:[%s4055_s19 + $0x20] sm:$0xff]  ;;  %v543_v0 = vld [vmem:[%s4055_s19 + $0x28] sm:$0x3]  ;;  %3630 = vmatprep.subr.bf16.mxu0 %v3865_v1  ;;  %v875_v35 = vld [vmem:[%s4589_s8 + $0x10] sm:$0xff] }
  0x26   : > { %v573_v58 = vrot.slane %v4085_v37, 2  ;;  %v574_v59 = vrot.slane %v541_v41, 2  ;;  %v725_v61 = vsel %vm550_vm1, %v723_v42, %v724_v50  ;;  %v556_v62 = vsel %vm550_vm1, %v554_v43, %v555_v51  ;;  %3650 = vmatpush3.bf16.msra.mxu1 %v3649_v55  ;;  %v873_v29 = vld [vmem:[%s4589_s8] sm:$0xff]  ;;  %v876_v38 = vld [vmem:[%s4589_s8 + $0x18] sm:$0xff]  ;;  %s3668_s14 = smul.u32 24, %s4014_s29  ;;  %s3870_s29 = smov 120  }
  0x27   : > { %v743_v7 = vsel %vm569_vm2, %v741_v56, %v742_v57  ;;  %v726_v9 = vrot.slane %v4114_v54, 1  ;;  %v727_v10 = vrot.slane %v713_v60, 1  ;;  %v557_v11 = vrot.slane %v4124_v63, 1  ;;  %3632 = vmatpush3.bf16.msra.mxu0 %v3631_v2  ;;  %3651 = vmatprep.subr.bf16.mxu1 %v3865_v1  ;;  %v3255_v57 = vld [vmem:[%s4588_s7] ss:$0 sm:$0xff] }
  0x28   : > { %560 = vrot.lane.b32.xlu0 %v553_v48, %s3868_s1  ;;  %579 = vrot.lane.b32.xlu1 %v572_v49, %s3869_s23  ;;  %v575_v8 = vsel %vm569_vm2, %v573_v58, %v574_v59  ;;  %v558_v13 = vrot.slane %v543_v0, 1  ;;  %v744_v17 = vrot.slane %v4114_v54, 2  ;;  %v745_v19 = vrot.slane %v713_v60, 2  ;;  %s531_s19 = scalar_lea.vmem %s4583_s2, %s3668_s14  ;;  %s536_s14 = scalar_lea.vmem %s4584_s3, %s3250_s30 }
  0x29   : > { %3633 = vmatprep.subr.bf16.mxu0 %v3865_v1  ;;  %v728_v16 = vsel %vm550_vm1, %v726_v9, %v727_v10  ;;  %v576_v20 = vrot.slane %v4124_v63, 2  ;;  %v577_v21 = vrot.slane %v543_v0, 2  ;;  %v3655_v34 = vpack.c.bf16 %v874_v30, %v873_v29  ;;  %v871_v55 = vld [vmem:[%s531_s19 + $0x8] sm:$0xff]  ;;  %v872_v56 = vld [vmem:[%s531_s19 + $0x10] sm:$0xff]  ;;  %v4282_v30 = vld [vmem:[%s536_s14] sm:$0xff]  ;;  %s3875_s14 = smov 24  }
  0x2a   : > { %v559_v18 = vsel %vm550_vm1, %v557_v11, %v558_v13  ;;  %3653 = vmatpush3.bf16.msra.mxu1 %v3652_v14  ;;  %v746_v23 = vsel %vm569_vm2, %v744_v17, %v745_v19  ;;  %v3658_v42 = vpack.c.bf16 %v876_v38, %v875_v35  ;;  %v3259_v17 = vld [vmem:[%s4590_s9] ss:$0 sm:$0xff] }
  0x2b   : > { %3635 = vmatpush3.bf16.msra.mxu0 %v3634_v15  ;;  %3486 = vmatprep.subr.mxu1 %v3867_v12  ;;  %v578_v25 = vsel %vm569_vm2, %v576_v20, %v577_v21 }
  0x2c   : > { %731 = vrot.lane.b32.xlu0 %v725_v61, %s3868_s1  ;;  %562 = vrot.lane.b32.xlu1 %v556_v62, %s3868_s1  ;;  %v3251_v61 = vld [vmem:[%s4586_s5] ss:$0 sm:$0xff] }
  0x2d   : > { %3654 = vmatprep.subr.bf16.mxu0 %v3865_v1 }
  0x30   : > { %749 = vrot.lane.b32.xlu0 %v743_v7, %s3869_s23  ;;  %581 = vrot.lane.b32.xlu1 %v575_v8, %s3869_s23 }
  0x34   : > { %733 = vrot.lane.b32.xlu0 %v728_v16, %s3868_s1  ;;  %564 = vrot.lane.b32.xlu1 %v559_v18, %s3868_s1  ;;  %s3669_s1 = smul.u32 384, %s3855_s24 }
  0x36   : > { %s4531_s30 = scalar_lea.hbm %s4593_s12, %s3669_s1 }
  0x38   : > { %751 = vrot.lane.b32.xlu0 %v746_v23, %s3869_s23  ;;  %583 = vrot.lane.b32.xlu1 %v578_v25, %s3869_s23 }
  0x96   : > { %v730_v26 = vpop.permute.xlu0 %729  ;;  %v748_v27 = vpop.permute.xlu1 %747 }
  0x97   : > { %v756_v28 = vsel %vm588_vm3, %v4070_v22, %v730_v26 }
  0x98   : > { %v759_v31 = vsel %vm592_vm4, %v756_v28, %v748_v27 }
  0x99   : > { %3456 = vmatmul.mubr.msk.f32.vlgmr.msra.gmra.mrb[0].mxu1 %vm615_vm5, %v759_v31 }
  0x9a   : > { %v561_v32 = vpop.permute.xlu0 %560  ;;  %v580_v33 = vpop.permute.xlu1 %579  ;;  %3458 = vmatprep.mubr.msk.f32.mxu1 %vm3866_vm0, %v3867_v12 }
  0x9b   : > { %v589_v22 = vsel %vm588_vm3, %v4074_v24, %v561_v32 }
  0x9c   : > { %v593_v39 = vsel %vm592_vm4, %v589_v22, %v580_v33 }
  0x9d   : > { %3423 = vmatmul.mubr.msk.f32.vlgmr.msra.gmra.mrb[0].mxu0 %vm615_vm5, %v593_v39 }
  0x9e   : > { %v732_v40 = vpop.permute.xlu0 %731  ;;  %v563_v41 = vpop.permute.xlu1 %562  ;;  %3425 = vmatprep.mubr.msk.f32.mxu0 %vm3866_vm0, %v3867_v12  ;;  %3656 = vmatpush3.bf16.msra.mxu0 %v3655_v34 }
  0x9f   : > { %3657 = vmatprep.subr.bf16.mxu0 %v3865_v1  ;;  %v757_v24 = vsel %vm588_vm3, %v4082_v36, %v732_v40  ;;  %v590_v43 = vsel %vm588_vm3, %v4085_v37, %v563_v41 }
  0xa2   : > { %v750_v44 = vpop.permute.xlu0 %749  ;;  %v582_v45 = vpop.permute.xlu1 %581  ;;  %3659 = vmatpush3.bf16.msra.mxu0 %v3658_v42 }
  0xa3   : > { %v760_v46 = vsel %vm592_vm4, %v757_v24, %v750_v44  ;;  %v594_v47 = vsel %vm592_vm4, %v590_v43, %v582_v45  ;;  %3481 = vmatprep.subr.mxu0 %v3867_v12 }
  0xa4   : > { %3459 = vmatmul.mubr.msk.f32.gmra.mrb[2].mxu1 %vm615_vm5, %v760_v46  ;;  %3426 = vmatmul.mubr.msk.f32.gmra.mrb[2].mxu0 %vm615_vm5, %v594_v47 }
  0xa5   : > { %3461 = vmatprep.mubr.msk.f32.mxu1 %vm3866_vm0, %v3867_v12  ;;  %3428 = vmatprep.mubr.msk.f32.mxu0 %vm3866_vm0, %v3867_v12 }
  0xa6   : > { %v734_v36 = vpop.permute.xlu0 %733  ;;  %v565_v37 = vpop.permute.xlu1 %564 }
  0xa7   : > { %v758_v48 = vsel %vm588_vm3, %v4114_v54, %v734_v36  ;;  %v591_v49 = vsel %vm588_vm3, %v4124_v63, %v565_v37  ;;  %v870_v54 = vld [vmem:[%s531_s19] sm:$0xff]  ;;  %s3873_s19 = smov 16  }
  0xaa   : > { %v752_v50 = vpop.permute.xlu0 %751  ;;  %v584_v51 = vpop.permute.xlu1 %583 }
  0xab   : > { %v761_v52 = vsel %vm592_vm4, %v758_v48, %v752_v50  ;;  %v595_v53 = vsel %vm592_vm4, %v591_v49, %v584_v51 }
  0xac   : > { %3462 = vmatmul.mubr.msk.f32.gmra.mrb[4].mxu1 %vm615_vm5, %v761_v52  ;;  %3429 = vmatmul.mubr.msk.f32.gmra.mrb[4].mxu0 %vm615_vm5, %v595_v53 }
  0xad   : > { %3472 = vmatprep.mubr.msk.f32.mxu0 %vm3866_vm0, %v3867_v12  ;;  %3488 = vmatprep.mubr.msk.f32.mxu1 %vm3866_vm0, %v3867_v12 }
  0xb0   : > { %3473 = vmatmul.mubr.msk.f32.vlgmr.msra.gmra.mrb[6].mxu0 %vm588_vm3, %v870_v54 }
  0xb1   : > { %3475 = vmatprep.mubr.msk.f32.mxu0 %vm3866_vm0, %v3867_v12 }
  0xb4   : > { %3476 = vmatmul.mubr.msk.f32.gmra.mrb[8].mxu0 %vm588_vm3, %v871_v55 }
  0xb5   : > { %3478 = vmatprep.mubr.msk.f32.mxu0 %vm3866_vm0, %v3867_v12 }
  0xb8   : > { %3479 = vmatmul.mubr.msk.f32.gmra.mrb[10].mxu0 %vm588_vm3, %v872_v56 }
  0xb9   : > { %3483 = vmatprep.mubr.msk.f32.mxu0 %vm3866_vm0, %v3867_v12 }
 0x16c   : > { %v856_v58 = vpop.f32.mrb[0].mxu1 }
 0x16d   : > { %v4229_v59 = vadd.f32 %v3255_v57, %v856_v58  ;;  %v3457_v60 = vpop.f32.mrb[1].mxu1 }
 0x16f   : > { %3482 = vmatpush3.xpose.msk.msra.mxu0 %vm974_vm6, %v4229_v59 }
 0x170   : > { %v691_v62 = vpop.f32.mrb[0].mxu0  ;;  %3496 = vmatprep.subr.mxu0 %v3867_v12 }
 0x171   : > { %v692_v63 = vadd.f32 %v3251_v61, %v691_v62  ;;  %v3424_v0 = vpop.f32.mrb[1].mxu0 }
 0x173   : > { %v4237_v2 = vmul.f32 0.35355338, %v692_v63 }
 0x175   : > { %3484 = vmatmul.mubr.msk.f32.vlgmr.msra.gmra.mrb[12].mxu0 %vm974_vm6, %v4237_v2 }
 0x176   : > { %3498 = vmatprep.mubr.msk.f32.mxu0 %vm3866_vm0, %v3867_v12 }
 0x177   : > { %v861_v3 = vpop.f32.mrb[2].mxu1  ;;  %v696_v4 = vpop.f32.mrb[2].mxu0 }
 0x178   : > { %v4243_v5 = vadd.f32 %v3255_v57, %v861_v3  ;;  %v697_v6 = vadd.f32 %v3251_v61, %v696_v4  ;;  %v3460_v7 = vpop.f32.mrb[3].mxu1  ;;  %v3427_v8 = vpop.f32.mrb[3].mxu0 }
 0x17a   : > { %v4245_v9 = vmul.f32 0.35355338, %v697_v6  ;;  %3487 = vmatpush3.xpose.msk.msra.mxu1 %vm974_vm6, %v4243_v5 }
 0x17b   : > { %3491 = vmatprep.subr.mxu1 %v3867_v12 }
 0x17d   : > { %3489 = vmatmul.mubr.msk.f32.vlgmr.msra.gmra.mrb[6].mxu1 %vm974_vm6, %v4245_v9 }
 0x17e   : > { %3493 = vmatprep.mubr.msk.f32.mxu1 %vm3866_vm0, %v3867_v12 }
 0x17f   : > { %v866_v10 = vpop.f32.mrb[4].mxu1  ;;  %v701_v11 = vpop.f32.mrb[4].mxu0 }
 0x180   : > { %v4254_v13 = vadd.f32 %v3255_v57, %v866_v10  ;;  %v702_v14 = vadd.f32 %v3251_v61, %v701_v11  ;;  %v3463_v15 = vpop.f32.mrb[5].mxu1  ;;  %v3430_v16 = vpop.f32.mrb[5].mxu0 }
 0x182   : > { %v4259_v18 = vmul.f32 0.35355338, %v702_v14  ;;  %3492 = vmatpush3.xpose.msk.msra.mxu1 %vm974_vm6, %v4254_v13 }
 0x183   : > { %v959_v19 = vpop.f32.mrb[6].mxu0  ;;  %3501 = vmatprep.subr.mxu1 %v3867_v12 }
 0x184   : > { %v4264_v20 = vadd.f32 %v3259_v17, %v959_v19  ;;  %v3474_v21 = vpop.f32.mrb[7].mxu0 }
 0x185   : > { %3494 = vmatmul.mubr.msk.f32.vlgmr.msra.gmra.mrb[8].mxu1 %vm974_vm6, %v4259_v18 }
 0x186   : > { %3497 = vmatpush3.msra.mxu0 %v4264_v20  ;;  %3503 = vmatprep.mubr.msk.f32.mxu1 %vm3866_vm0, %v3867_v12 }
 0x187   : > { %3506 = vmatprep.subr.mxu0 %v3867_v12  ;;  %v964_v23 = vpop.f32.mrb[8].mxu0 }
 0x188   : > { %v4272_v25 = vadd.f32 %v3259_v17, %v964_v23  ;;  %v3477_v26 = vpop.f32.mrb[9].mxu0 }
 0x18a   : > { %3502 = vmatpush3.msra.mxu1 %v4272_v25 }
 0x18b   : > { %v969_v27 = vpop.f32.mrb[10].mxu0  ;;  %3511 = vmatprep.subr.mxu1 %v3867_v12 }
 0x18c   : > { %v4276_v28 = vadd.f32 %v3259_v17, %v969_v27  ;;  %v3480_v29 = vpop.f32.mrb[11].mxu0 }
 0x248   : > { %v1047_v31 = vpop.f32.mrb[12].mxu0 }
 0x249   : > { %v1048_v32 = vadd.f32 %v1047_v31, %v4282_v30  ;;  %v3485_v33 = vpop.f32.mrb[13].mxu0 }
 0x24b   : > { %v1203_v34 = vsel %vm974_vm6, %v1048_v32, -inf }
 0x24c   : > { %1204 = vmax.xlane.f32.xlu0 %v1203_v34 }
 0x250   : > { %v1123_v22 = vpop.f32.mrb[6].mxu1 }
 0x251   : > { %v1124_v35 = vadd.f32 %v1123_v22, %v4282_v30  ;;  %v3490_v38 = vpop.f32.mrb[7].mxu1 }
 0x253   : > { %v1206_v39 = vsel %vm974_vm6, %v1124_v35, -inf }
 0x254   : > { %1207 = vmax.xlane.f32.xlu1 %v1206_v39 }
 0x258   : > { %v1199_v40 = vpop.f32.mrb[8].mxu1 }
 0x259   : > { %v1200_v41 = vadd.f32 %v1199_v40, %v4282_v30  ;;  %v3495_v42 = vpop.f32.mrb[9].mxu1 }
 0x25b   : > { %v1209_v24 = vsel %vm974_vm6, %v1200_v41, -inf }
 0x25c   : > { %1210 = vmax.xlane.f32.xlu0 %v1209_v24 }
 0x265   : > { %1457 = vrot.lane.b32.xlu1 %v4229_v59, %s3870_s29 }
 0x269   : > { %1535 = vrot.lane.b32.xlu1 %v4243_v5, %s3870_s29 }
 0x2d9   : > { %v1205_v43 = vpop.xlane.xlu0 %1204 }
 0x2da   : > { %v1212_v44 = vsub.f32 %v1048_v32, %v1205_v43 }
 0x2dc   : > { %v1215_v45 = vmul.f32 1.442695, %v1212_v44 }
 0x2de   : > { %3737 = vpow2.f32 %v1215_v45 }
 0x2e1   : > { %v1208_v46 = vpop.xlane.xlu1 %1207 }
 0x2e2   : > { %v1213_v47 = vsub.f32 %v1124_v35, %v1208_v46 }
 0x2e4   : > { %v1217_v36 = vmul.f32 1.442695, %v1213_v47 }
 0x2e5   : > { %v1458_v56 = vpop.permute.xlu1 %1457 }
 0x2e6   : > { %3739 = vpow2.f32 %v1217_v36 }
 0x2e8   : > { %v3738_v37 = vpop.eup %3737 }
 0x2e9   : > { %v1221_v48 = vsel %vm974_vm6, %v3738_v37, 0.0  ;;  %v1211_v51 = vpop.xlane.xlu0 %1210  ;;  %v1536_v58 = vpop.permute.xlu1 %1535 }
 0x2ea   : > { %1222 = vadd.xlane.f32.xlu0 %v1221_v48  ;;  %v1214_v52 = vsub.f32 %v1200_v41, %v1211_v51 }
 0x2ec   : > { %v1219_v53 = vmul.f32 1.442695, %v1214_v52 }
 0x2ee   : > { %3741 = vpow2.f32 %v1219_v53 }
 0x2f0   : > { %v3740_v49 = vpop.eup %3739 }
 0x2f1   : > { %v1224_v50 = vsel %vm974_vm6, %v3740_v49, 0.0 }
 0x2f2   : > { %1225 = vadd.xlane.f32.xlu1 %v1224_v50 }
 0x2f8   : > { %v3742_v54 = vpop.eup %3741 }
 0x2f9   : > { %v1227_v55 = vsel %vm974_vm6, %v3742_v54, 0.0 }
 0x300   : > { %1455 = vrot.lane.b32.xlu0 %v4237_v2, %s3870_s29 }
 0x303   : > { %1613 = vrot.lane.b32.xlu1 %v4254_v13, %s3870_s29 }
 0x307   : > { %1611 = vrot.lane.b32.xlu1 %v4259_v18, %s3870_s29 }
 0x31f   : > { %1228 = vadd.xlane.f32.xlu0 %v1227_v55 }
 0x335   : > { %1533 = vrot.lane.b32.xlu0 %v4245_v9, %s3870_s29 }
 0x377   : > { %v1223_v57 = vpop.xlane.xlu0 %1222 }
 0x378   : > { %3743 = vrcp.f32 %v1223_v57 }
 0x37b   : > { %v1456_v4 = vpop.permute.xlu0 %1455 }
 0x37f   : > { %v1226_v60 = vpop.xlane.xlu1 %1225 }
 0x380   : > { %3745 = vrcp.f32 %v1226_v60 }
 0x382   : > { %v3744_v61 = vpop.eup %3743 }
 0x383   : > { %v1233_v62 = vmul.f32 %v3744_v61, %v3738_v37  ;;  %v1614_v3 = vpop.permute.xlu1 %1613 }
 0x385   : > { %3499 = vmatmul.mubr.msk.f32.vlgmr.msra.gmra.mrb[14].mxu0 %vm974_vm6, %v1233_v62 }
 0x386   : > { %3507 = vmatpush3.msra.mxu0 %v4276_v28  ;;  %3508 = vmatprep.mubr.msk.f32.mxu0 %vm3866_vm0, %v3867_v12 }
 0x387   : > { %3516 = vmatprep.subr.mxu0 %v3867_v12  ;;  %v1612_v6 = vpop.permute.xlu1 %1611 }
 0x38a   : > { %v3746_v63 = vpop.eup %3745 }
 0x38b   : > { %v1234_v0 = vmul.f32 %v3746_v63, %v3740_v49 }
 0x38d   : > { %3504 = vmatmul.mubr.msk.f32.vlgmr.msra.gmra.mrb[10].mxu1 %vm974_vm6, %v1234_v0 }
 0x38e   : > { %3512 = vmatpush3.xpose.msk.msra.mxu1 %vm974_vm6, %v1458_v56  ;;  %3513 = vmatprep.mubr.msk.f32.mxu1 %vm3866_vm0, %v3867_v12 }
 0x38f   : > { %3521 = vmatprep.subr.mxu1 %v3867_v12 }
 0x391   : > { %3514 = vmatmul.mubr.msk.f32.vlgmr.msra.gmra.mrb[12].mxu1 %vm974_vm6, %v1456_v4 }
 0x392   : > { %3522 = vmatpush3.xpose.msk.msra.mxu1 %vm974_vm6, %v1614_v3  ;;  %3523 = vmatprep.mubr.msk.f32.mxu1 %vm3866_vm0, %v3867_v12 }
 0x393   : > { %3531 = vmatprep.subr.mxu1 %v3867_v12 }
 0x395   : > { %3524 = vmatmul.mubr.msk.f32.vlgmr.msra.gmra.mrb[14].mxu1 %vm974_vm6, %v1612_v6 }
 0x396   : > { %3533 = vmatprep.mubr.msk.f32.mxu1 %vm3866_vm0, %v3867_v12 }
 0x3ac   : > { %v1229_v7 = vpop.xlane.xlu0 %1228 }
 0x3ad   : > { %3747 = vrcp.f32 %v1229_v7 }
 0x3b0   : > { %v1534_v11 = vpop.permute.xlu0 %1533 }
 0x3b7   : > { %v3748_v8 = vpop.eup %3747 }
 0x3b8   : > { %v1235_v10 = vmul.f32 %v3748_v8, %v3742_v54 }
 0x3ba   : > { %3509 = vmatmul.mubr.msk.f32.vlgmr.msra.gmra.mrb[16].mxu0 %vm974_vm6, %v1235_v10 }
 0x3bb   : > { %3517 = vmatpush3.xpose.msk.msra.mxu0 %vm974_vm6, %v1536_v58  ;;  %3518 = vmatprep.mubr.msk.f32.mxu0 %vm3866_vm0, %v3867_v12 }
 0x3bc   : > { %3526 = vmatprep.subr.mxu0 %v3867_v12 }
 0x3be   : > { %3519 = vmatmul.mubr.msk.f32.vlgmr.msra.gmra.mrb[18].mxu0 %vm974_vm6, %v1534_v11 }
 0x3bf   : > { %3528 = vmatprep.mubr.msk.f32.mxu0 %vm3866_vm0, %v3867_v12 }
 0x458   : > { %v4331_v14 = vpop.f32.mrb[14].mxu0 }
 0x459   : > { %v3500_v15 = vpop.f32.mrb[15].mxu0 }
 0x460   : > { %v4333_v16 = vpop.f32.mrb[10].mxu1 }
 0x461   : > { %v3505_v17 = vpop.f32.mrb[11].mxu1 }
 0x464   : > { %v1529_v19 = vpop.f32.mrb[12].mxu1 }
 0x465   : > { %v1530_v21 = vadd.f32 %v1529_v19, %v4282_v30  ;;  %v3515_v23 = vpop.f32.mrb[13].mxu1 }
 0x467   : > { %v1689_v26 = vsel %vm974_vm6, %v1530_v21, -inf }
 0x468   : > { %1690 = vmax.xlane.f32.xlu0 %v1689_v26  ;;  %v1685_v27 = vpop.f32.mrb[14].mxu1 }
 0x469   : > { %v1686_v29 = vadd.f32 %v1685_v27, %v4282_v30  ;;  %v3525_v31 = vpop.f32.mrb[15].mxu1 }
 0x46b   : > { %v1695_v32 = vsel %vm974_vm6, %v1686_v29, -inf }
 0x46c   : > { %1696 = vmax.xlane.f32.xlu0 %v1695_v32 }
 0x482   : > { %1800 = vrot.lane.b32.xlu0 %v4272_v25, %s3870_s29 }
 0x48d   : > { %v4341_v33 = vpop.f32.mrb[16].mxu0 }
 0x48e   : > { %v3510_v34 = vpop.f32.mrb[17].mxu0 }
 0x491   : > { %v1607_v22 = vpop.f32.mrb[18].mxu0 }
 0x492   : > { %v1608_v35 = vadd.f32 %v1607_v22, %v4282_v30  ;;  %v3520_v38 = vpop.f32.mrb[19].mxu0 }
 0x494   : > { %v1692_v39 = vsel %vm974_vm6, %v1608_v35, -inf }
 0x495   : > { %1693 = vmax.xlane.f32.xlu1 %v1692_v39 }
 0x4a6   : > { %1723 = vrot.lane.b32.xlu1 %v4264_v20, %s3870_s29 }
 0x4aa   : > { %1877 = vrot.lane.b32.xlu1 %v4276_v28, %s3870_s29  ;;  %s498_s29 = sand.u32 1, %s3847_s22  }
 0x4ab   : > { %s4534_s15 = scalar_lea.sflag [#allocation3], %s498_s29 }
 0x4ae   : > { %1955 = vrot.lane.b32.xlu1 %v4229_v59, %s3871_s25 }
 0x4b2   : > { %1953 = vrot.lane.b32.xlu1 %v4237_v2, %s3871_s25 }
 0x4f5   : > { %v1691_v40 = vpop.xlane.xlu0 %1690 }
 0x4f6   : > { %v1698_v41 = vsub.f32 %v1530_v21, %v1691_v40 }
 0x4f8   : > { %v1701_v42 = vmul.f32 1.442695, %v1698_v41 }
 0x4f9   : > { %v1697_v24 = vpop.xlane.xlu0 %1696 }
 0x4fa   : > { %3749 = vpow2.f32 %v1701_v42  ;;  %v1700_v36 = vsub.f32 %v1686_v29, %v1697_v24 }
 0x4fc   : > { %v1705_v49 = vmul.f32 1.442695, %v1700_v36 }
 0x4fd   : > { %v1801_v43 = vpop.permute.xlu0 %1800 }
 0x4fe   : > { %3532 = vmatpush3.msra.mxu1 %v1801_v43 }
 0x4ff   : > { %3541 = vmatprep.subr.mxu1 %v3867_v12 }
 0x504   : > { %v3750_v44 = vpop.eup %3749 }
 0x505   : > { %v1707_v45 = vsel %vm974_vm6, %v3750_v44, 0.0 }
 0x506   : > { %1708 = vadd.xlane.f32.xlu0 %v1707_v45 }
 0x51c   : > { %2033 = vrot.lane.b32.xlu0 %v4243_v5, %s3871_s25 }
 0x522   : > { %v1694_v46 = vpop.xlane.xlu1 %1693 }
 0x523   : > { %v1699_v47 = vsub.f32 %v1608_v35, %v1694_v46 }
 0x525   : > { %v1703_v37 = vmul.f32 1.442695, %v1699_v47 }
 0x526   : > { %v1724_v48 = vpop.permute.xlu1 %1723 }
 0x527   : > { %3751 = vpow2.f32 %v1703_v37  ;;  %3527 = vmatpush3.msra.mxu0 %v1724_v48 }
 0x528   : > { %3536 = vmatprep.subr.mxu0 %v3867_v12  ;;  %3753 = vpow2.f32 %v1705_v49 }
 0x52a   : > { %v1878_v57 = vpop.permute.xlu1 %1877 }
 0x52e   : > { %v1956_v58 = vpop.permute.xlu1 %1955 }
 0x531   : > { %v3752_v50 = vpop.eup %3751 }
 0x532   : > { %v1710_v51 = vsel %vm974_vm6, %v3752_v50, 0.0  ;;  %v3754_v52 = vpop.eup %3753  ;;  %v1954_v60 = vpop.permute.xlu1 %1953 }
 0x533   : > { %1711 = vadd.xlane.f32.xlu1 %v1710_v51  ;;  %v1713_v53 = vsel %vm974_vm6, %v3754_v52, 0.0 }
 0x53b   : > { %1714 = vadd.xlane.f32.xlu0 %v1713_v53 }
 0x544   : > { %2111 = vrot.lane.b32.xlu1 %v4254_v13, %s3871_s25 }
 0x551   : > { %2031 = vrot.lane.b32.xlu0 %v4245_v9, %s3871_s25 }
 0x555   : > { %2109 = vrot.lane.b32.xlu0 %v4259_v18, %s3871_s25 }
 0x593   : > { %v1709_v54 = vpop.xlane.xlu0 %1708 }
 0x594   : > { %3755 = vrcp.f32 %v1709_v54 }
 0x597   : > { %v2034_v62 = vpop.permute.xlu0 %2033 }
 0x59e   : > { %v3756_v55 = vpop.eup %3755 }
 0x59f   : > { %v1719_v56 = vmul.f32 %v3756_v55, %v3750_v44 }
 0x5a1   : > { %3529 = vmatmul.mubr.msk.f32.vlgmr.msra.gmra.mrb[20].mxu0 %vm974_vm6, %v1719_v56 }
 0x5a2   : > { %3537 = vmatpush3.msra.mxu0 %v1878_v57  ;;  %3538 = vmatprep.mubr.msk.f32.mxu0 %vm3866_vm0, %v3867_v12 }
 0x5a3   : > { %3546 = vmatprep.subr.mxu0 %v3867_v12 }
 0x5c0   : > { %v1712_v61 = vpop.xlane.xlu1 %1711 }
 0x5c1   : > { %3757 = vrcp.f32 %v1712_v61 }
 0x5c4   : > { %v2112_v6 = vpop.permute.xlu1 %2111 }
 0x5c8   : > { %v1715_v63 = vpop.xlane.xlu0 %1714 }
 0x5c9   : > { %3759 = vrcp.f32 %v1715_v63 }
 0x5cb   : > { %v3758_v0 = vpop.eup %3757 }
 0x5cc   : > { %v1720_v3 = vmul.f32 %v3758_v0, %v3752_v50  ;;  %v2032_v4 = vpop.permute.xlu0 %2031 }
 0x5ce   : > { %3534 = vmatmul.mubr.msk.f32.vlgmr.msra.gmra.mrb[16].mxu1 %vm974_vm6, %v1720_v3 }
 0x5cf   : > { %3542 = vmatpush3.xpose.msk.msra.mxu1 %vm974_vm6, %v1956_v58  ;;  %3543 = vmatprep.mubr.msk.f32.mxu1 %vm3866_vm0, %v3867_v12 }
 0x5d0   : > { %3551 = vmatprep.subr.mxu1 %v3867_v12  ;;  %v2110_v10 = vpop.permute.xlu0 %2109 }
 0x5d2   : > { %3544 = vmatmul.mubr.msk.f32.vlgmr.msra.gmra.mrb[18].mxu1 %vm974_vm6, %v1954_v60 }
 0x5d3   : > { %v3760_v7 = vpop.eup %3759  ;;  %3552 = vmatpush3.xpose.msk.msra.mxu1 %vm974_vm6, %v2112_v6  ;;  %3553 = vmatprep.mubr.msk.f32.mxu1 %vm3866_vm0, %v3867_v12 }
 0x5d4   : > { %v1721_v8 = vmul.f32 %v3760_v7, %v3754_v52  ;;  %3561 = vmatprep.subr.mxu1 %v3867_v12 }
 0x5d6   : > { %3539 = vmatmul.mubr.msk.f32.vlgmr.msra.gmra.mrb[22].mxu0 %vm974_vm6, %v1721_v8  ;;  %3554 = vmatmul.mubr.msk.f32.vlgmr.msra.gmra.mrb[20].mxu1 %vm974_vm6, %v2110_v10 }
 0x5d7   : > { %3547 = vmatpush3.xpose.msk.msra.mxu0 %vm974_vm6, %v2034_v62  ;;  %3548 = vmatprep.mubr.msk.f32.mxu0 %vm3866_vm0, %v3867_v12 }
 0x5d8   : > { %3556 = vmatprep.subr.mxu0 %v3867_v12  ;;  %3563 = vmatprep.mubr.msk.f32.mxu1 %vm3866_vm0, %v3867_v12 }
 0x5da   : > { %3549 = vmatmul.mubr.msk.f32.vlgmr.msra.gmra.mrb[24].mxu0 %vm974_vm6, %v2032_v4 }
 0x5db   : > { %3558 = vmatprep.mubr.msk.f32.mxu0 %vm3866_vm0, %v3867_v12 }
 0x674   : > { %v4391_v11 = vpop.f32.mrb[20].mxu0 }
 0x675   : > { %v3530_v15 = vpop.f32.mrb[21].mxu0 }
 0x6a1   : > { %v4393_v17 = vpop.f32.mrb[16].mxu1 }
 0x6a2   : > { %v3535_v19 = vpop.f32.mrb[17].mxu1 }
 0x6a5   : > { %v2027_v21 = vpop.f32.mrb[18].mxu1 }
 0x6a6   : > { %v2028_v23 = vadd.f32 %v2027_v21, %v4282_v30  ;;  %v3545_v26 = vpop.f32.mrb[19].mxu1 }
 0x6a8   : > { %v2187_v27 = vsel %vm974_vm6, %v2028_v23, -inf }
 0x6a9   : > { %2188 = vmax.xlane.f32.xlu1 %v2187_v27  ;;  %v4397_v29 = vpop.f32.mrb[22].mxu0  ;;  %v2183_v31 = vpop.f32.mrb[20].mxu1 }
 0x6aa   : > { %v3540_v32 = vpop.f32.mrb[23].mxu0  ;;  %v3555_v34 = vpop.f32.mrb[21].mxu1  ;;  %v2184_v39 = vadd.f32 %v2183_v31, %v4282_v30 }
 0x6ac   : > { %v2193_v41 = vsel %vm974_vm6, %v2184_v39, -inf }
 0x6ad   : > { %v2105_v22 = vpop.f32.mrb[24].mxu0 }
 0x6ae   : > { %v2106_v35 = vadd.f32 %v2105_v22, %v4282_v30  ;;  %v3550_v38 = vpop.f32.mrb[25].mxu0 }
 0x6b0   : > { %v2190_v40 = vsel %vm974_vm6, %v2106_v35, -inf }
 0x6b1   : > { %2191 = vmax.xlane.f32.xlu0 %v2190_v40 }
 0x6b5   : > { %2194 = vmax.xlane.f32.xlu0 %v2193_v41 }
 0x6ba   : > { %2220 = vrot.lane.b32.xlu1 %v4264_v20, %s3871_s25 }
 0x6be   : > { %2372 = vrot.lane.b32.xlu1 %v4276_v28, %s3871_s25 }
 0x6cb   : > { %2296 = vrot.lane.b32.xlu0 %v4272_v25, %s3871_s25  ;;  %s3666_s25 = smul.u32 24, %s498_s29 }
 0x6cd   : > { %s500_s20 = scalar_lea.vmem [#allocation2], %s3666_s25 }
 0x6ce   : > { %s3109_s27 = sshll.u32 %s500_s20, 4  ;;  %s4526_s27 = int_to_ptr.vmem [resolvable:$true] %s3109_s27 }
 0x6cf   : > { %s3785_s24 = scalar_lea.vmem %s4526_s27, 384 }
 0x6d0   : > { %p3786_p12 = scmp.ne.s32.totalorder %s4526_s27, %s3785_s24 }
 0x6d2   : > { %p3787_p13 = pnand %p3786_p12, %p3983_p4 }
 0x6d4   : > { %p3788_p0 = pneg %p3787_p13 }
 0x736   : > { %v2189_v42 = vpop.xlane.xlu1 %2188 }
 0x737   : > { %v2196_v24 = vsub.f32 %v2028_v23, %v2189_v42 }
 0x739   : > { %v2199_v43 = vmul.f32 1.442695, %v2196_v24 }
 0x73a   : > { %v2221_v44 = vpop.permute.xlu1 %2220 }
 0x73b   : > { %3761 = vpow2.f32 %v2199_v43  ;;  %3557 = vmatpush3.msra.mxu0 %v2221_v44 }
 0x73c   : > { %3566 = vmatprep.subr.mxu0 %v3867_v12 }
 0x73e   : > { %v2192_v45 = vpop.xlane.xlu0 %2191 }
 0x73f   : > { %v2197_v46 = vsub.f32 %v2106_v35, %v2192_v45 }
 0x741   : > { %v2201_v47 = vmul.f32 1.442695, %v2197_v46 }
 0x742   : > { %v2195_v36 = vpop.xlane.xlu0 %2194 }
 0x743   : > { %3763 = vpow2.f32 %v2201_v47  ;;  %v2198_v52 = vsub.f32 %v2184_v39, %v2195_v36 }
 0x745   : > { %v3762_v37 = vpop.eup %3761  ;;  %v2203_v53 = vmul.f32 1.442695, %v2198_v52 }
 0x746   : > { %v2297_v48 = vpop.permute.xlu0 %2296  ;;  %v2205_v49 = vsel %vm974_vm6, %v3762_v37, 0.0 }
 0x747   : > { %2206 = vadd.xlane.f32.xlu1 %v2205_v49  ;;  %3562 = vmatpush3.msra.mxu1 %v2297_v48  ;;  %3765 = vpow2.f32 %v2203_v53 }
 0x748   : > { %3571 = vmatprep.subr.mxu1 %v3867_v12 }
 0x74d   : > { %v3764_v50 = vpop.eup %3763 }
 0x74e   : > { %v2208_v51 = vsel %vm974_vm6, %v3764_v50, 0.0 }
 0x74f   : > { %2209 = vadd.xlane.f32.xlu0 %v2208_v51 }
 0x751   : > { %v3766_v54 = vpop.eup %3765 }
 0x752   : > { %v2211_v55 = vsel %vm974_vm6, %v3766_v54, 0.0 }
 0x758   : > { %2448 = vrot.lane.b32.xlu1 %v4237_v2, %s3872_s18  ;;  %v2373_v2 = vpop.permute.xlu1 %2372 }
 0x75c   : > { %2526 = vrot.lane.b32.xlu1 %v4245_v9, %s3872_s18 }
 0x765   : > { %2450 = vrot.lane.b32.xlu0 %v4229_v59, %s3872_s18 }
 0x769   : > { %2528 = vrot.lane.b32.xlu0 %v4243_v5, %s3872_s18 }
 0x76d   : > { %2606 = vrot.lane.b32.xlu0 %v4254_v13, %s3872_s18 }
 0x780   : > { %2212 = vadd.xlane.f32.xlu1 %v2211_v55 }
 0x791   : > { %2604 = vrot.lane.b32.xlu1 %v4259_v18, %s3872_s18 }
 0x7d4   : > { %v2207_v9 = vpop.xlane.xlu1 %2206 }
 0x7d5   : > { %3767 = vrcp.f32 %v2207_v9 }
 0x7d8   : > { %v2449_v18 = vpop.permute.xlu1 %2448 }
 0x7dc   : > { %v2210_v59 = vpop.xlane.xlu0 %2209  ;;  %v2527_v62 = vpop.permute.xlu1 %2526 }
 0x7dd   : > { %3769 = vrcp.f32 %v2210_v59 }
 0x7df   : > { %v3768_v56 = vpop.eup %3767 }
 0x7e0   : > { %v2217_v5 = vmul.f32 %v3768_v56, %v3762_v37  ;;  %v2451_v57 = vpop.permute.xlu0 %2450  ;;  %v2990_v56 = vld [vmem:[%s4591_s10] sm:$0xff] }
 0x7e2   : > { %3559 = vmatmul.mubr.msk.f32.vlgmr.msra.gmra.mrb[26].mxu0 %vm974_vm6, %v2217_v5  ;;  %v2991_v5 = vld [vmem:[%s4591_s10 + $0x8] sm:$0xff] }
 0x7e3   : > { %3567 = vmatpush3.msra.mxu0 %v2373_v2  ;;  %3568 = vmatprep.mubr.msk.f32.mxu0 %vm3866_vm0, %v3867_v12 }
 0x7e4   : > { %3576 = vmatprep.subr.mxu0 %v3867_v12  ;;  %v2529_v60 = vpop.permute.xlu0 %2528 }
 0x7e7   : > { %v3770_v13 = vpop.eup %3769 }
 0x7e8   : > { %v2218_v58 = vmul.f32 %v3770_v13, %v3764_v50  ;;  %v2607_v61 = vpop.permute.xlu0 %2606  ;;  %v3661_v13 = vpack.c.bf16 %v2991_v5, %v2990_v56 }
 0x7ea   : > { %3564 = vmatmul.mubr.msk.f32.vlgmr.msra.gmra.mrb[22].mxu1 %vm974_vm6, %v2218_v58  ;;  %v2993_v58 = vld [vmem:[%s4591_s10 + $0x18] sm:$0xff] }
 0x7eb   : > { %3572 = vmatpush3.xpose.msk.msra.mxu1 %vm974_vm6, %v2451_v57  ;;  %3573 = vmatprep.mubr.msk.f32.mxu1 %vm3866_vm0, %v3867_v12  ;;  %v2992_v57 = vld [vmem:[%s4591_s10 + $0x10] sm:$0xff] }
 0x7ec   : > { %3581 = vmatprep.subr.mxu1 %v3867_v12 }
 0x7ee   : > { %3574 = vmatmul.mubr.msk.f32.vlgmr.msra.gmra.mrb[24].mxu1 %vm974_vm6, %v2449_v18 }
 0x7ef   : > { %3582 = vmatpush3.xpose.msk.msra.mxu1 %vm974_vm6, %v2607_v61  ;;  %3583 = vmatprep.mubr.msk.f32.mxu1 %vm3866_vm0, %v3867_v12 }
 0x7f0   : > { %3591 = vmatprep.subr.mxu1 %v3867_v12 }
 0x80d   : > { %v2213_v63 = vpop.xlane.xlu1 %2212 }
 0x80e   : > { %3771 = vrcp.f32 %v2213_v63 }
 0x811   : > { %v2605_v0 = vpop.permute.xlu1 %2604 }
 0x812   : > { %3584 = vmatmul.mubr.msk.f32.vlgmr.msra.gmra.mrb[26].mxu1 %vm974_vm6, %v2605_v0 }
 0x813   : > { %3593 = vmatprep.mubr.msk.f32.mxu1 %vm3866_vm0, %v3867_v12 }
 0x818   : > { %v3772_v3 = vpop.eup %3771 }
 0x819   : > { %v2219_v4 = vmul.f32 %v3772_v3, %v3766_v54 }
 0x81b   : > { %3569 = vmatmul.mubr.msk.f32.vlgmr.msra.gmra.mrb[28].mxu0 %vm974_vm6, %v2219_v4 }
 0x81c   : > { %3577 = vmatpush3.xpose.msk.msra.mxu0 %vm974_vm6, %v2529_v60  ;;  %3578 = vmatprep.mubr.msk.f32.mxu0 %vm3866_vm0, %v3867_v12  ;;  %v3664_v60 = vpack.c.bf16 %v2993_v58, %v2992_v57 }
 0x81d   : > { %3586 = vmatprep.subr.mxu0 %v3867_v12 }
 0x81f   : > { %3579 = vmatmul.mubr.msk.f32.vlgmr.msra.gmra.mrb[30].mxu0 %vm974_vm6, %v2527_v62 }
 0x820   : > { %3588 = vmatprep.mubr.msk.f32.mxu0 %vm3866_vm0, %v3867_v12 }
 0x8b5   : > { %v2292_v6 = vpop.f32.mrb[26].mxu0 }
 0x8b6   : > { %v3560_v7 = vpop.f32.mrb[27].mxu0 }
 0x8bd   : > { %v2368_v8 = vpop.f32.mrb[22].mxu1 }
 0x8be   : > { %v3565_v10 = vpop.f32.mrb[23].mxu1 }
 0x8c1   : > { %v2522_v15 = vpop.f32.mrb[24].mxu1 }
 0x8c2   : > { %v2523_v19 = vadd.f32 %v2522_v15, %v4282_v30  ;;  %v3575_v21 = vpop.f32.mrb[25].mxu1 }
 0x8c4   : > { %v2682_v23 = vsel %vm974_vm6, %v2523_v19, -inf }
 0x8c5   : > { %2683 = vmax.xlane.f32.xlu0 %v2682_v23 }
 0x8e5   : > { %v2678_v26 = vpop.f32.mrb[26].mxu1 }
 0x8e6   : > { %v2679_v27 = vadd.f32 %v2678_v26, %v4282_v30  ;;  %v3585_v31 = vpop.f32.mrb[27].mxu1 }
 0x8e8   : > { %v2688_v32 = vsel %vm974_vm6, %v2679_v27, -inf }
 0x8e9   : > { %2689 = vmax.xlane.f32.xlu0 %v2688_v32 }
 0x8ee   : > { %v4455_v34 = vpop.f32.mrb[28].mxu0 }
 0x8ef   : > { %v3570_v22 = vpop.f32.mrb[29].mxu0 }
 0x8f0   : > { %v3299_v22 = vld [vmem:[%s4592_s11] ss:$0 sm:$0xff] }
 0x8f2   : > { %v2600_v35 = vpop.f32.mrb[30].mxu0 }
 0x8f3   : > { %v2601_v38 = vadd.f32 %v2600_v35, %v4282_v30  ;;  %v3580_v39 = vpop.f32.mrb[31].mxu0 }
 0x8f5   : > { %v2685_v40 = vsel %vm974_vm6, %v2601_v38, -inf }
 0x8f6   : > { %2686 = vmax.xlane.f32.xlu1 %v2685_v40 }
 0x907   : > { %2715 = vrot.lane.b32.xlu1 %v4264_v20, %s3872_s18 }
 0x952   : > { %v2684_v41 = vpop.xlane.xlu0 %2683 }
 0x953   : > { %v2691_v42 = vsub.f32 %v2523_v19, %v2684_v41 }
 0x955   : > { %v2694_v24 = vmul.f32 1.442695, %v2691_v42 }
 0x957   : > { %3773 = vpow2.f32 %v2694_v24 }
 0x961   : > { %v3774_v43 = vpop.eup %3773 }
 0x962   : > { %v2700_v44 = vsel %vm974_vm6, %v3774_v43, 0.0 }
 0x963   : > { %2701 = vadd.xlane.f32.xlu0 %v2700_v44 }
 0x976   : > { %v2690_v45 = vpop.xlane.xlu0 %2689 }
 0x977   : > { %v2693_v46 = vsub.f32 %v2679_v27, %v2690_v45 }
 0x979   : > { %v2698_v47 = vmul.f32 1.442695, %v2693_v46 }
 0x97b   : > { %3775 = vpow2.f32 %v2698_v47 }
 0x983   : > { %v2687_v30 = vpop.xlane.xlu1 %2686 }
 0x984   : > { %v2692_v36 = vsub.f32 %v2601_v38, %v2687_v30 }
 0x985   : > { %v3776_v37 = vpop.eup %3775 }
 0x986   : > { %v2696_v48 = vmul.f32 1.442695, %v2692_v36  ;;  %v2706_v49 = vsel %vm974_vm6, %v3776_v37, 0.0 }
 0x987   : > { %v2716_v50 = vpop.permute.xlu1 %2715  ;;  %2707 = vadd.xlane.f32.xlu0 %v2706_v49 }
 0x988   : > { %3777 = vpow2.f32 %v2696_v48  ;;  %3587 = vmatpush3.msra.mxu0 %v2716_v50 }
 0x989   : > { %3596 = vmatprep.subr.mxu0 %v3867_v12 }
 0x992   : > { %v3778_v20 = vpop.eup %3777 }
 0x993   : > { %v2703_v51 = vsel %vm974_vm6, %v3778_v20, 0.0 }
 0x994   : > { %2704 = vadd.xlane.f32.xlu1 %v2703_v51 }
 0x99d   : > { %2791 = vrot.lane.b32.xlu0 %v4272_v25, %s3872_s18 }
 0x9a1   : > { %2958 = vrot.lane.b32.xlu0 %v2292_v6, %s3873_s19 }
 0x9a5   : > { %2867 = vrot.lane.b32.xlu1 %v4276_v28, %s3872_s18  ;;  %2948 = vrot.lane.b32.xlu0 %v4393_v17, %s3874_s16 }
 0x9a9   : > { %2946 = vrot.lane.b32.xlu1 %v4391_v11, %s3874_s16 }
 0x9ad   : > { %2960 = vrot.lane.b32.xlu1 %v2368_v8, %s3873_s19 }
 0x9f0   : > { %v2702_v52 = vpop.xlane.xlu0 %2701 }
 0x9f1   : > { %3779 = vrcp.f32 %v2702_v52 }
 0x9fb   : > { %v3780_v53 = vpop.eup %3779 }
 0x9fc   : > { %v2712_v54 = vmul.f32 %v3780_v53, %v3774_v43 }
 0x9fe   : > { %3589 = vmatmul.mubr.msk.f32.vlgmr.msra.gmra.mrb[32].mxu0 %vm974_vm6, %v2712_v54 }
 0x9ff   : > { %3598 = vmatprep.mubr.msk.f32.mxu0 %vm3866_vm0, %v3867_v12 }
 0xa14   : > { %v2708_v25 = vpop.xlane.xlu0 %2707 }
 0xa15   : > { %3781 = vrcp.f32 %v2708_v25 }
 0xa18   : > { %v2792_v28 = vpop.permute.xlu0 %2791 }
 0xa19   : > { %3592 = vmatpush3.msra.mxu1 %v2792_v28 }
 0xa1a   : > { %3660 = vmatprep.subr.bf16.mxu1 %v3865_v1 }
 0xa1c   : > { %v2959_v7 = vpop.permute.xlu0 %2958 }
 0xa1f   : > { %v3782_v55 = vpop.eup %3781 }
 0xa20   : > { %v2714_v11 = vmul.f32 %v3782_v55, %v3776_v37  ;;  %v2949_v15 = vpop.permute.xlu0 %2948 }
 0xa21   : > { %v2705_v17 = vpop.xlane.xlu1 %2704  ;;  %v2980_v19 = vsel %vm974_vm6, %v4333_v16, %v2949_v15 }
 0xa22   : > { %3783 = vrcp.f32 %v2705_v17 }
 0xa25   : > { %v2868_v2 = vpop.permute.xlu1 %2867 }
 0xa26   : > { %3597 = vmatpush3.msra.mxu0 %v2868_v2 }
 0xa27   : > { %3599 = vmatmul.mubr.msk.f32.vlgmr.msra.gmra.mrb[34].mxu0 %vm974_vm6, %v2714_v11 }
 0xa29   : > { %v2947_v4 = vpop.permute.xlu1 %2946 }
 0xa2c   : > { %v3784_v9 = vpop.eup %3783 }
 0xa2d   : > { %v2713_v59 = vmul.f32 %v3784_v9, %v3778_v20  ;;  %v2961_v6 = vpop.permute.xlu1 %2960 }
 0xa2f   : > { %3594 = vmatmul.mubr.msk.f32.vlgmr.msra.gmra.mrb[28].mxu1 %vm974_vm6, %v2713_v59 }
 0xa30   : > { %3609 = vmatprep.mubr.msk.f32.mxu1 %vm3866_vm0, %v3867_v12  ;;  %3662 = vmatpush3.bf16.msra.mxu1 %v3661_v13 }
 0xa31   : > { %3663 = vmatprep.subr.bf16.mxu1 %v3865_v1  ;;  %v2979_v1 = vsel %vm974_vm6, %v4331_v14, %v2947_v4  ;;  %v2984_v14 = vsel %vm2982_vm7, %v2980_v19, %v2961_v6 }
 0xa34   : > { %3665 = vmatpush3.bf16.msra.mxu1 %v3664_v60 }
 0xad1   : > { %v2787_v18 = vpop.f32.mrb[32].mxu0 }
 0xad2   : > { %2970 = vrot.lane.b32.xlu1 %v2787_v18, %s3875_s14  ;;  %v3590_v61 = vpop.f32.mrb[33].mxu0 }
 0xad6   : > { %2950 = vrot.lane.b32.xlu1 %v4397_v29, %s3874_s16  ;;  %v2983_v29 = vsel %vm2982_vm7, %v2979_v1, %v2959_v7 }
 0xafa   : > { %v2939_v62 = vpop.f32.mrb[34].mxu0 }
 0xafb   : > { %2974 = vrot.lane.b32.xlu1 %v2939_v62, %s3875_s14  ;;  %v3600_v63 = vpop.f32.mrb[35].mxu0 }
 0xb02   : > { %v2863_v0 = vpop.f32.mrb[28].mxu1 }
 0xb03   : > { %2972 = vrot.lane.b32.xlu0 %v2863_v0, %s3875_s14  ;;  %v3595_v3 = vpop.f32.mrb[29].mxu1  ;;  %s3789_s14 = sshll.u32 %s3876_s17, 4  ;;  %s3790_s14 = int_to_ptr.vmem [resolvable:$false] %s3789_s14 }
 0xb04   : > { %s3791_s25 = scalar_lea.vmem %s3790_s14, 768  ;;  %p3792_p1 = scmp.lt.s32.totalorder %s4526_s27, %s3790_s14 }
 0xb05   : > { %p3793_p2 = scmp.lt.s32.totalorder %s3791_s25, %s3785_s24 }
 0xb07   : > { %2962 = vrot.lane.b32.xlu0 %v4455_v34, %s3873_s19  ;;  %p3794_p3 = por %p3793_p2, %p3792_p1 }
 0xb09   : > { %p3795_p5 = pnand %p3794_p3, %p3788_p0 }
 0xb44   : > { %v2971_v8 = vpop.permute.xlu1 %2970 }
 0xb45   : > { %v2987_v10 = vsel %vm2986_vm8, %v2983_v29, %v2971_v8 }
 0xb46   : > { %3610 = vmatmul.mubr.msk.f32.vlgmr.msra.gmra.mrb[30].mxu1 %vm588_vm3, %v2987_v10 }
 0xb47   : > { %3612 = vmatprep.mubr.msk.f32.mxu1 %vm3866_vm0, %v3867_v12 }
 0xb48   : > { %v2951_v23 = vpop.permute.xlu1 %2950 }
 0xb49   : > { %v2981_v27 = vsel %vm974_vm6, %v4341_v33, %v2951_v23 }
 0xb6d   : > { %v2975_v32 = vpop.permute.xlu1 %2974 }
 0xb75   : > { %v2973_v21 = vpop.permute.xlu0 %2972 }
 0xb76   : > { %v2988_v26 = vsel %vm2986_vm8, %v2984_v14, %v2973_v21 }
 0xb77   : > { %3613 = vmatmul.mubr.msk.f32.gmra.mrb[32].mxu1 %vm588_vm3, %v2988_v26 }
 0xb78   : > { %3615 = vmatprep.mubr.msk.f32.mxu1 %vm3866_vm0, %v3867_v12 }
 0xb79   : > { %v2963_v31 = vpop.permute.xlu0 %2962 }
 0xb7a   : > { %v2985_v34 = vsel %vm2982_vm7, %v2981_v27, %v2963_v31 }
 0xb7b   : > { %v2989_v16 = vsel %vm2986_vm8, %v2985_v34, %v2975_v32 }
 0xb7c   : > { %3616 = vmatmul.mubr.msk.f32.gmra.mrb[34].mxu1 %vm588_vm3, %v2989_v16 }
 0xc19   : > { %v3076_v35 = vpop.f32.mrb[30].mxu1 }
 0xc1a   : > { %v3077_v12 = vadd.f32 %v3299_v22, %v3076_v35  ;;  %v3611_v38 = vpop.f32.mrb[31].mxu1 }
 0xc1c   : > { %3090 = vst.msk [vmem:[%s500_s20] sm:$0xff] %vm588_vm3, %v3077_v12 }
 0xc4a   : > { %v3081_v33 = vpop.f32.mrb[32].mxu1 }
 0xc4b   : > { %v3082_v39 = vadd.f32 %v3299_v22, %v3081_v33  ;;  %v3614_v40 = vpop.f32.mrb[33].mxu1 }
 0xc4d   : > { %3091 = vst.msk [vmem:[%s500_s20 + $0x8] sm:$0xff] %vm588_vm3, %v3082_v39 }
 0xc4f   : > { %v3086_v41 = vpop.f32.mrb[34].mxu1 }
 0xc50   : > { %v3087_v42 = vadd.f32 %v3299_v22, %v3086_v41  ;;  %v3617_v24 = vpop.f32.mrb[35].mxu1 }
 0xc52   : > { %3092 = vst.msk [vmem:[%s500_s20 + $0x10] sm:$0xff] %vm588_vm3, %v3087_v42 }
 0xc53   : > { %3798 = shalt.err (!%p3795_p5)
}
 0xc54   : > { %s3799_s29 = scalar_lea.hbm %s4531_s30, 384  ;;  %s3803_s20 = scalar_lea.hbm %s4593_s12, 768 }
 0xc55   : > { %p3800_p6 = scmp.ne.s32.totalorder %s4531_s30, %s3799_s29  ;;  %p3804_p10 = scmp.lt.u32.totalorder %s4531_s30, %s4593_s12 }
 0xc56   : > { %p3805_p11 = scmp.lt.u32.totalorder %s3803_s20, %s3799_s29  ;;  %p3807_p13 = scmp.lt.u32.totalorder %s3799_s29, %s4531_s30 }
 0xc57   : > { %p3801_p7 = pnand %p3800_p6, %p3983_p4 }
 0xc58   : > { %p3806_p12 = por %p3805_p11, %p3804_p10 }
 0xc59   : > { %p3802_p9 = pneg %p3801_p7 }
 0xc5a   : > { %p3808_p0 = por %p3807_p13, %p3806_p12 }
 0xc5c   : > { %p3809_p1 = pnand %p3808_p0, %p3802_p9 }
 0xc5e   : > { %3812 = shalt.err (!%p3809_p1)
}
 0xc5f   : > { %s3877_s23 = smov 128  }
 0xc60   : > { %3670 = dma.vmem_to_hbm [thread:$0]  (%p3983_p4), %s4526_s27, 384, %s4531_s30, %s4534_s15, %s3877_s23, %s3877_s23, %s3874_s16  }
 0xc61 PF: > { %p3676_p2 = scmp.ge.s32.totalorder %s3863_s26, 2  ;;  %s3124_s17 = sand.u32 1, %s3843_s21  }
 0xc62   : > { %s3125_s14 = scalar_lea.sflag [#allocation3], %s3124_s17 }
 0xc63   : > { %p3673_p3 = pnand %p3676_p2, %p3990_p8 }
 0xc65   : > { %3838 = dma.done.wait (!%p3673_p3), %s3125_s14, 384  }
 0xc66   : > { %3840 = vsyncadd (!%p3673_p3), %s3125_s14, 4294966912  ;;  %s25_s26 = sadd.s32 1, %s3863_s26   ;;  %s4608_s13 = sld [smem:[#allocation5_spill]] }
 0xc67   : > { %p22_p5 = scmp.ge.s32.totalorder %s25_s26, 4   ;;  %s4609_s23 = sld [smem:[#allocation9_spill]] }
 0xc68   : > { %s4610_s24 = sld [smem:[#allocation6_spill]]  ;;  %s4611_s25 = sld [smem:[#allocation7_spill]] }
 0xc69   : > { %s4612_s21 = smov %s3847_s22  ;;  %24 = sbr.rel (!%p22_p5) target bundleno = 6 (0x6), region = 112 }
 0xc6c   : > { %s4613_s22 = smov %s4608_s13 }
 0xc70   :  { %3130 = vsyncpa [#allocation3], 1 }
 0xc71   :  { %3132 = vsyncpa [#allocation3 + $0x1], 1 }

</bundles_post_ra>
